<compile_context>
chip_gen: v7x
topology: tpu7x:2x2x1
jax: 0.10.0
libtpu: 0.0.40
codegen_flags: <defaults>
</compile_context>

<pallas_src>
import jax
import jax.numpy as jnp
import numpy as np
from jax.experimental import pallas as pl
from jax.experimental.pallas import tpu as pltpu

jax.config.update("jax_default_matmul_precision", "highest")


# ----------------------------- Pallas kernels -----------------------------

def _proj_kernel(x_ref, w1_ref, bn1_ref, wqkv_ref, bqkv_ref, qkv_ref):
    """linear1 (no bias) -> BN1 -> ReLU -> fused [q|k|v] projection (one matmul)."""
    x = x_ref[...]                                                 # (tile, Cin)
    h = jnp.dot(x, w1_ref[...], preferred_element_type=jnp.float32)
    x1 = jnp.maximum(h * bn1_ref[0:1, :] + bn1_ref[1:2, :], 0.0)   # (tile, C)
    qkv_ref[...] = (jnp.dot(x1, wqkv_ref[...],
                            preferred_element_type=jnp.float32) + bqkv_ref[...])


def _attn_post_kernel(q_ref, gk_ref, gv_ref, prel_ref, idn_ref, x0_ref,
                      wp1_ref, bp1_ref, bnp_ref, wp2_ref, bp2_ref,
                      bnw1_ref, ww1_ref, bw1_ref, bnw2_ref, ww2_ref, bw2_ref,
                      tile_ref,
                      bn2_ref, wl3_ref, bn3_ref,
                      wm1_ref, bm1_ref, bnm_ref, wm2_ref,
                      out_ref):
    """PointTransformerLayer + block epilogue + GenericMLP head for one point tile."""
    tn, ns, c = gk_ref.shape
    cs = ww1_ref.shape[1]

    # ---- position MLP on relative xyz: K=3 layers done as VPU FMAs (off the MXU) ----
    prel = prel_ref[...]                                           # (tn, ns, 3)
    pr = (prel[:, :, 0:1] * wp1_ref[0:1, :]
          + prel[:, :, 1:2] * wp1_ref[1:2, :]
          + prel[:, :, 2:3] * wp1_ref[2:3, :] + bp1_ref[...])      # (tn, ns, 3)
    pr = jnp.maximum(pr * bnp_ref[0:1, :] + bnp_ref[1:2, :], 0.0)
    pr = (pr[:, :, 0:1] * wp2_ref[0:1, :]
          + pr[:, :, 1:2] * wp2_ref[1:2, :]
          + pr[:, :, 2:3] * wp2_ref[2:3, :] + bp2_ref[...])        # (tn, ns, C)

    # ---- attention-weight MLP, batched over tn*ns rows (single big matmuls) ----
    w3d = gk_ref[...] - q_ref[...][:, None, :] + pr                # (tn, ns, C)
    wf = jnp.maximum(w3d * bnw1_ref[0:1, :] + bnw1_ref[1:2, :], 0.0)
    wf = wf.reshape(tn * ns, c)
    wf = jnp.dot(wf, ww1_ref[...], preferred_element_type=jnp.float32) + bw1_ref[...]
    wf = jnp.maximum(wf * bnw2_ref[0:1, :] + bnw2_ref[1:2, :], 0.0)
    wf = jnp.dot(wf, ww2_ref[...], preferred_element_type=jnp.float32) + bw2_ref[...]

    # ---- softmax over the neighbor axis ----
    ws = wf.reshape(tn, ns, cs)
    ws = ws - jnp.max(ws, axis=1, keepdims=True)
    e = jnp.exp(ws)
    ws = e / jnp.sum(e, axis=1, keepdims=True)                     # (tn, ns, C/s)

    # ---- share-plane broadcast of the weights via a 0/1 matmul, then aggregate ----
    wfull = jnp.dot(ws.reshape(tn * ns, cs), tile_ref[...],
                    preferred_element_type=jnp.float32).reshape(tn, ns, c)
    y = jnp.sum((gv_ref[...] + pr) * wfull, axis=1)                # (tn, C)

    # ---- block epilogue: BN2 -> ReLU -> linear3 -> BN3 -> +identity -> ReLU ----
    y = jnp.maximum(y * bn2_ref[0:1, :] + bn2_ref[1:2, :], 0.0)
    z = jnp.dot(y, wl3_ref[...], preferred_element_type=jnp.float32)
    z = z * bn3_ref[0:1, :] + bn3_ref[1:2, :]
    xb = jnp.maximum(z + idn_ref[...], 0.0)                        # (tn, C)

    # ---- GenericMLP head: conv1(k=1)+bias -> BN -> ReLU -> conv2(k=1, no bias) ----
    hmid = jnp.dot(xb, wm1_ref[...], preferred_element_type=jnp.float32) + bm1_ref[...]
    hmid = jnp.maximum(hmid * bnm_ref[0:1, :] + bnm_ref[1:2, :], 0.0)
    x3 = jnp.dot(hmid, wm2_ref[...], preferred_element_type=jnp.float32)   # (tn, 3)

    # single lane-dense store of the final xyz refinement
    out_ref[...] = x0_ref[...] + x3


# ----------------------------- wrappers ------------------------------------

def _round_up(x, m):
    return ((x + m - 1) // m) * m


def _pad_rows(a, n_pad):
    n = a.shape[0]
    if n == n_pad:
        return a
    pad = [(0, n_pad - n)] + [(0, 0)] * (a.ndim - 1)
    return jnp.pad(a, pad)


def _full_spec(arr):
    nd = arr.ndim
    return pl.BlockSpec(arr.shape, lambda i, _nd=nd: (0,) * _nd)


def proj_forward(x, W1, bn1, Wqkv, bqkv, *, tile_n=256):
    n, cin = x.shape
    c3 = Wqkv.shape[1]
    tile_n = min(tile_n, _round_up(n, 8))
    n_pad = _round_up(n, tile_n)
    xp = _pad_rows(x, n_pad)
    params = (W1, bn1, Wqkv, bqkv)
    in_specs = [pl.BlockSpec((tile_n, cin), lambda i: (i, 0))] + \
               [_full_spec(a) for a in params]
    qkv = pl.pallas_call(
        _proj_kernel,
        grid=(n_pad // tile_n,),
        in_specs=in_specs,
        out_specs=pl.BlockSpec((tile_n, c3), lambda i: (i, 0)),
        out_shape=jax.ShapeDtypeStruct((n_pad, c3), jnp.float32),
        compiler_params=pltpu.CompilerParams(dimension_semantics=("parallel",)),
    )(xp, *params)
    return qkv[:n]


def attn_post_mlp_forward(q, gk, gv, prel, identity, x0, tilemat, params, *, tile_n=64):
    n, ns, c = gk.shape
    tile_n = min(tile_n, _round_up(n, 8))
    n_pad = _round_up(n, tile_n)
    qp = _pad_rows(q, n_pad)
    gkp = _pad_rows(gk, n_pad)
    gvp = _pad_rows(gv, n_pad)
    prelp = _pad_rows(prel, n_pad)
    idnp = _pad_rows(identity, n_pad)
    x0p = _pad_rows(x0, n_pad)
    plist = (params["Wp1"], params["bp1"], params["bnp"], params["Wp2"], params["bp2"],
             params["bnw1"], params["Ww1"], params["bw1"],
             params["bnw2"], params["Ww2"], params["bw2"],
             tilemat,
             params["bn2"], params["W3"], params["bn3"],
             params["Wm1"], params["bm1"], params["bnm"], params["Wm2"])
    in_specs = [pl.BlockSpec((tile_n, c), lambda i: (i, 0)),
                pl.BlockSpec((tile_n, ns, c), lambda i: (i, 0, 0)),
                pl.BlockSpec((tile_n, ns, c), lambda i: (i, 0, 0)),
                pl.BlockSpec((tile_n, ns, 3), lambda i: (i, 0, 0)),
                pl.BlockSpec((tile_n, c), lambda i: (i, 0)),
                pl.BlockSpec((tile_n, 3), lambda i: (i, 0))] + \
               [_full_spec(a) for a in plist]
    out = pl.pallas_call(
        _attn_post_kernel,
        grid=(n_pad // tile_n,),
        in_specs=in_specs,
        out_specs=pl.BlockSpec((tile_n, 3), lambda i: (i, 0)),
        out_shape=jax.ShapeDtypeStruct((n_pad, 3), jnp.float32),
        compiler_params=pltpu.CompilerParams(dimension_semantics=("parallel",)),
    )(qp, gkp, gvp, prelp, idnp, x0p, *plist)
    return out[:n]


# ----------------------- KNN grouping (JAX glue) ---------------------------
# TODO(synk): pointops.queryandgroup's CUDA KNN + gather is reproduced with a
# dense distance matrix + top_k + take in plain JAX (data-dependent, not in Pallas).

def knn_indices(p, o, nsample):
    n = p.shape[0]
    pid = jnp.arange(n)
    batch = jnp.sum(pid[:, None] >= o[None, :], axis=1)       # batch id per point
    d2 = jnp.sum((p[:, None, :] - p[None, :, :]) ** 2, axis=-1)
    d2 = jnp.where(batch[:, None] != batch[None, :], jnp.inf, d2)
    _, idx = jax.lax.top_k(-d2, nsample)                      # ascending distance
    return idx


# ----------------------- full PointTransfRef forward ------------------------

def point_transf_ref_forward(pxo, transf_features, params, *, nsample=16,
                             share_planes=8):
    bsize, npts, cxyz = pxo.shape
    enc_dim = transf_features.shape[1]
    c = params["W1"].shape[1]
    cs = c // share_planes

    p0 = pxo.reshape(-1, cxyz)
    x0 = pxo.reshape(-1, cxyz)
    o0 = jnp.array([npts * (i + 1) for i in range(bsize)], dtype=jnp.int32)
    # TODO(synk): only the `idxs == []` path of PointTransfRef.forward is implemented.
    t0 = jnp.transpose(transf_features, (0, 2, 1)).reshape(-1, enc_dim)

    # fused [q|k|v] weights and share-plane broadcast matrix (host-side packing)
    Wqkv = jnp.concatenate([params["Wq"], params["Wk"], params["Wv"]], axis=1)
    bqkv = jnp.concatenate([params["bq"], params["bk"], params["bv"]], axis=1)
    tilemat = (jnp.arange(c)[None, :] % cs
               == jnp.arange(cs)[:, None]).astype(jnp.float32)      # (C/s, C)

    qkv = proj_forward(t0, params["W1"], params["bn1"], Wqkv, bqkv)
    q, k, v = qkv[:, :c], qkv[:, c:2 * c], qkv[:, 2 * c:]

    idx = knn_indices(p0, o0, nsample)                          # (N, nsample)
    prel = p0[idx] - p0[:, None, :]                             # (N, nsample, 3)
    gk, gv = k[idx], v[idx]                                     # (N, nsample, C)

    out_flat = attn_post_mlp_forward(q, gk, gv, prel, t0, x0, tilemat, params)
    return out_flat.reshape(bsize, npts, cxyz).transpose(0, 2, 1)   # (B, 3, npts)


# ----------------------- pure-JAX reference ---------------------------------

def reference_forward(pxo, transf_features, params, *, nsample=16, share_planes=8):
    bsize, npts, cxyz = pxo.shape
    enc_dim = transf_features.shape[1]
    s = share_planes

    p0 = pxo.reshape(-1, cxyz)
    x0 = pxo.reshape(-1, cxyz)
    o0 = jnp.array([npts * (i + 1) for i in range(bsize)], dtype=jnp.int32)
    t0 = jnp.transpose(transf_features, (0, 2, 1)).reshape(-1, enc_dim)

    x1 = jnp.maximum((t0 @ params["W1"]) * params["bn1"][0] + params["bn1"][1], 0.0)
    q = x1 @ params["Wq"] + params["bq"][0]
    k = x1 @ params["Wk"] + params["bk"][0]
    v = x1 @ params["Wv"] + params["bv"][0]

    idx = knn_indices(p0, o0, nsample)
    prel = p0[idx] - p0[:, None, :]
    gk, gv = k[idx], v[idx]

    pr = prel @ params["Wp1"] + params["bp1"][0]
    pr = jnp.maximum(pr * params["bnp"][0] + params["bnp"][1], 0.0)
    pr = pr @ params["Wp2"] + params["bp2"][0]                  # (N, ns, C)

    w = gk - q[:, None, :] + pr
    w = jnp.maximum(w * params["bnw1"][0] + params["bnw1"][1], 0.0)
    w = w @ params["Ww1"] + params["bw1"][0]
    w = jnp.maximum(w * params["bnw2"][0] + params["bnw2"][1], 0.0)
    w = w @ params["Ww2"] + params["bw2"][0]                    # (N, ns, C/s)
    w = jax.nn.softmax(w, axis=1)

    n_, ns_, c_ = gv.shape
    y = ((gv + pr).reshape(n_, ns_, s, c_ // s) * w[:, :, None, :]
         ).sum(1).reshape(n_, c_)
    y = jnp.maximum(y * params["bn2"][0] + params["bn2"][1], 0.0)
    z = (y @ params["W3"]) * params["bn3"][0] + params["bn3"][1]
    x2 = jnp.maximum(z + t0, 0.0)

    h = x2 @ params["Wm1"] + params["bm1"][0]
    h = jnp.maximum(h * params["bnm"][0] + params["bnm"][1], 0.0)
    x3 = h @ params["Wm2"]
    out = x0 + x3
    return out.reshape(bsize, npts, cxyz).transpose(0, 2, 1)


# ----------------------- deterministic init --------------------------------

def init_params(key, enc_dim, out_planes, share_planes):
    c = out_planes
    cs = c // share_planes
    hid = enc_dim // 2
    keys = iter(jax.random.split(key, 64))

    def lin(shape, scale=0.2):
        return scale * jax.random.normal(next(keys), shape, jnp.float32)

    def bn_pack(dim):
        gamma = 1.0 + 0.1 * jax.random.normal(next(keys), (dim,), jnp.float32)
        beta = 0.1 * jax.random.normal(next(keys), (dim,), jnp.float32)
        mean = 0.1 * jax.random.normal(next(keys), (dim,), jnp.float32)
        var = 1.0 + 0.1 * jax.random.uniform(next(keys), (dim,), jnp.float32)
        scale = gamma / jnp.sqrt(var + 1e-5)
        shift = beta - mean * scale
        return jnp.stack([scale, shift], axis=0)              # (2, dim)

    return dict(
        W1=lin((enc_dim, c)), bn1=bn_pack(c),
        Wq=lin((c, c)), bq=lin((1, c)),
        Wk=lin((c, c)), bk=lin((1, c)),
        Wv=lin((c, c)), bv=lin((1, c)),
        Wp1=lin((3, 3)), bp1=lin((1, 3)), bnp=bn_pack(3),
        Wp2=lin((3, c)), bp2=lin((1, c)),
        bnw1=bn_pack(c),
        Ww1=lin((c, cs)), bw1=lin((1, cs)),
        bnw2=bn_pack(cs),
        Ww2=lin((cs, cs)), bw2=lin((1, cs)),
        bn2=bn_pack(c),
        W3=lin((c, c)),
        bn3=bn_pack(c),
        Wm1=lin((c, hid)), bm1=lin((1, hid)), bnm=bn_pack(hid),
        Wm2=lin((hid, 3)),
    )


# --------------------------------- main -------------------------------------

if __name__ == "__main__":
    BSIZE, NPTS = 2, 32
    ENC_DIM, OUT_PLANES = 128, 128          # module defaults (enc_dim == out_planes)
    NSAMPLE, SHARE = 16, 8

    key = jax.random.PRNGKey(0)
    kp, kt, kparam = jax.random.split(key, 3)
    pxo = jax.random.normal(kp, (BSIZE, NPTS, 3), jnp.float32)
    transf_features = jax.random.normal(kt, (BSIZE, ENC_DIM, NPTS), jnp.float32)
    params = init_params(kparam, ENC_DIM, OUT_PLANES, SHARE)

    out = point_transf_ref_forward(pxo, transf_features, params,
                                   nsample=NSAMPLE, share_planes=SHARE)
    out = jax.block_until_ready(out)

    ref = reference_forward(pxo, transf_features, params,
                            nsample=NSAMPLE, share_planes=SHARE)
    np.testing.assert_allclose(np.asarray(out), np.asarray(ref),
                               rtol=1e-4, atol=1e-4)
    print("KERNEL_OK")
</pallas_src>

<mosaic_0001>
module attributes {stable_mosaic.version = 11 : i64} {
  func.func @_proj_kernel(%arg0: i32, %arg1: memref<64x128xf32, #tpu.memory_space<vmem>>, %arg2: memref<128x128xf32, #tpu.memory_space<vmem>>, %arg3: memref<2x128xf32, #tpu.memory_space<vmem>>, %arg4: memref<128x384xf32, #tpu.memory_space<vmem>>, %arg5: memref<1x384xf32, #tpu.memory_space<vmem>>, %arg6: memref<64x384xf32, #tpu.memory_space<vmem>>) attributes {dimension_semantics = [#tpu.dimension_semantics<parallel>], iteration_bounds = array<i64: 1>, scalar_prefetch = 0 : i64, scratch_operands = 0 : i64, tpu.core_type = #tpu.core_type<tc>, window_params = [{transform_indices = @transform_0, window_bounds = array<i64: 64, 128>}, {pipeline_mode = #tpu.pipeline_mode<synchronous>, transform_indices = @transform_1, window_bounds = array<i64: 128, 128>}, {pipeline_mode = #tpu.pipeline_mode<synchronous>, transform_indices = @transform_2, window_bounds = array<i64: 2, 128>}, {pipeline_mode = #tpu.pipeline_mode<synchronous>, transform_indices = @transform_3, window_bounds = array<i64: 128, 384>}, {pipeline_mode = #tpu.pipeline_mode<synchronous>, transform_indices = @transform_4, window_bounds = array<i64: 1, 384>}, {transform_indices = @transform_5, window_bounds = array<i64: 64, 384>}]} {
    %c0 = arith.constant 0 : index
    %c0_0 = arith.constant 0 : index
    %0 = vector.load %arg1[%c0, %c0_0] : memref<64x128xf32, #tpu.memory_space<vmem>>, vector<64x128xf32>
    %c0_1 = arith.constant 0 : index
    %c0_2 = arith.constant 0 : index
    %1 = vector.load %arg2[%c0_1, %c0_2] : memref<128x128xf32, #tpu.memory_space<vmem>>, vector<128x128xf32>
    %cst = arith.constant dense<0.000000e+00> : vector<64x128xf32>
    %2 = tpu.matmul %0, %1, %cst {dimension_numbers = #tpu.dot_dimension_numbers<[1], [0], [0], [1], [0, 0, 1, 1], [], []>, precision = #tpu.contract_precision<fp32>} : vector<64x128xf32>, vector<128x128xf32>, vector<64x128xf32> -> vector<64x128xf32>
    %c0_3 = arith.constant 0 : index
    %c0_4 = arith.constant 0 : index
    %3 = vector.load %arg3[%c0_3, %c0_4] : memref<2x128xf32, #tpu.memory_space<vmem>>, vector<1x128xf32>
    %4 = vector.broadcast %3 : vector<1x128xf32> to vector<64x128xf32>
    %5 = arith.mulf %2, %4 : vector<64x128xf32>
    %c1 = arith.constant 1 : index
    %c0_5 = arith.constant 0 : index
    %6 = vector.load %arg3[%c1, %c0_5] : memref<2x128xf32, #tpu.memory_space<vmem>>, vector<1x128xf32>
    %7 = vector.broadcast %6 : vector<1x128xf32> to vector<64x128xf32>
    %8 = arith.addf %5, %7 : vector<64x128xf32>
    %cst_6 = arith.constant 0.000000e+00 : f32
    %9 = vector.broadcast %cst_6 : f32 to vector<64x128xf32>
    %10 = arith.maximumf %8, %9 : vector<64x128xf32>
    %c0_7 = arith.constant 0 : index
    %c0_8 = arith.constant 0 : index
    %11 = vector.load %arg4[%c0_7, %c0_8] : memref<128x384xf32, #tpu.memory_space<vmem>>, vector<128x384xf32>
    %cst_9 = arith.constant dense<0.000000e+00> : vector<64x384xf32>
    %12 = tpu.matmul %10, %11, %cst_9 {dimension_numbers = #tpu.dot_dimension_numbers<[1], [0], [0], [1], [0, 0, 1, 1], [], []>, precision = #tpu.contract_precision<fp32>} : vector<64x128xf32>, vector<128x384xf32>, vector<64x384xf32> -> vector<64x384xf32>
    %c0_10 = arith.constant 0 : index
    %c0_11 = arith.constant 0 : index
    %13 = vector.load %arg5[%c0_10, %c0_11] : memref<1x384xf32, #tpu.memory_space<vmem>>, vector<1x384xf32>
    %14 = vector.broadcast %13 : vector<1x384xf32> to vector<64x384xf32>
    %15 = arith.addf %12, %14 : vector<64x384xf32>
    %c0_12 = arith.constant 0 : index
    %c0_13 = arith.constant 0 : index
    %16 = vector.load %arg6[%c0_12, %c0_13] : memref<64x384xf32, #tpu.memory_space<vmem>>, vector<64x384xf32>
    tpu.vector_store %arg6[%c0_12, %c0_13], %15 {strides = array<i32>} : memref<64x384xf32, #tpu.memory_space<vmem>>, vector<64x384xf32>,
    return
  }
  func.func @transform_0(%arg0: i32) -> (i32, i32) {
    %c0_i32 = arith.constant 0 : i32
    %c0_i32_0 = arith.constant 0 : i32
    return %arg0, %c0_i32 : i32, i32
  }
  func.func @transform_1(%arg0: i32) -> (i32, i32) {
    %c0_i32 = arith.constant 0 : i32
    %c0_i32_0 = arith.constant 0 : i32
    %c0_i32_1 = arith.constant 0 : i32
    return %c0_i32, %c0_i32_0 : i32, i32
  }
  func.func @transform_2(%arg0: i32) -> (i32, i32) {
    %c0_i32 = arith.constant 0 : i32
    %c0_i32_0 = arith.constant 0 : i32
    %c0_i32_1 = arith.constant 0 : i32
    return %c0_i32, %c0_i32_0 : i32, i32
  }
  func.func @transform_3(%arg0: i32) -> (i32, i32) {
    %c0_i32 = arith.constant 0 : i32
    %c0_i32_0 = arith.constant 0 : i32
    %c0_i32_1 = arith.constant 0 : i32
    return %c0_i32, %c0_i32_0 : i32, i32
  }
  func.func @transform_4(%arg0: i32) -> (i32, i32) {
    %c0_i32 = arith.constant 0 : i32
    %c0_i32_0 = arith.constant 0 : i32
    %c0_i32_1 = arith.constant 0 : i32
    return %c0_i32, %c0_i32_0 : i32, i32
  }
  func.func @transform_5(%arg0: i32) -> (i32, i32) {
    %c0_i32 = arith.constant 0 : i32
    %c0_i32_0 = arith.constant 0 : i32
    return %arg0, %c0_i32 : i32, i32
  }
}

</mosaic_0001>

<bundles_post_ra>
// kernel: tpu_custom_call.1
= control target key start
LH: loop header
LB: loop body
LE: loop exit
PB: predicated region body
PF: predicated region fallthrough
CT: control target
= control target key end

     0   :  { %10 = vsyncpa [#allocation3], 0  ;;  %s6456_s0 = inlined_call_operand.hbm [shape: f32[64,128], index: 0, kind: input, shape index: {}]   ;;  %s6457_s1 = inlined_call_operand.hbm [shape: f32[128,128], index: 1, kind: input, shape index: {}]   ;;  %s6458_s2 = inlined_call_operand.vmem [shape: f32[2,128], index: 2, kind: input, shape index: {}]   ;;  %s6459_s3 = inlined_call_operand.hbm [shape: f32[128,384], index: 3, kind: input, shape index: {}]   ;;  %s6460_s4 = inlined_call_operand.vmem [shape: f32[1,384], index: 4, kind: input, shape index: {}]   ;;  %s6461_s5 = inlined_call_operand.hbm [shape: f32[64,384], index: 5, kind: output, shape index: {}]  }
   0x1   :  { %11 = vsyncpa [#allocation6], 0 }
   0x2   :  { %12 = vsyncpa [#allocation4], 0  ;;  %s4990_s18 = smov [#allocation5]   ;;  %s4991_s20 = smov [#allocation2]  }
   0x3   :  { %s30_s19 = sshll.u32 %s4990_s18, 4  ;;  %s18_s21 = sshll.u32 %s4991_s20, 4  ;;  %s31_s19 = int_to_ptr.vmem [resolvable:$true] %s30_s19  ;;  %s5029_s21 = int_to_ptr.vmem [resolvable:$true] %s18_s21 }
   0x4   :  { %s4896_s24 = scalar_lea.hbm %s6457_s1, 2048 }
   0x5   :  { %p4897_p0 = scmp.ne.s32.totalorder %s6457_s1, %s4896_s24  ;;  %p4900_p1 = scmp.lt.u32.totalorder %s4896_s24, %s6457_s1 }
   0x7   :  { %p4902_p2 = pnand %p4900_p1, %p4897_p0 }
   0x9   :  { %4905 = shalt.err (!%p4902_p2)
}
   0xa   :  { %s4906_s29 = scalar_lea.vmem %s31_s19, 2048  ;;  %p4911_p4 = scmp.lt.s32.totalorder %s31_s19, %s31_s19 }
   0xb   :  { %p4907_p3 = scmp.ne.s32.totalorder %s31_s19, %s4906_s29  ;;  %p4912_p5 = scmp.lt.s32.totalorder %s4906_s29, %s4906_s29 }
   0xd   :  { %p4913_p6 = por %p4912_p5, %p4911_p4 }
   0xf   :  { %p4914_p7 = pnand %p4913_p6, %p4907_p3 }
  0x11   :  { %4917 = shalt.err (!%p4914_p7)
}
  0x12   :  { %s4992_s30 = smov 128   ;;  %s4993_s6 = smov 8  }
  0x13   :  { %36 = dma.hbm_to_vmem [thread:$0]  %s6457_s1, 2048, %s31_s19, [#allocation6], %s4992_s30, %s4992_s30, %s4993_s6  }
  0x14   :  { %s4918_s11 = scalar_lea.hbm %s6456_s0, 1024 }
  0x15   :  { %p4919_p8 = scmp.ne.s32.totalorder %s6456_s0, %s4918_s11  ;;  %p4922_p9 = scmp.lt.u32.totalorder %s4918_s11, %s6456_s0 }
  0x17   :  { %p4924_p10 = pnand %p4922_p9, %p4919_p8 }
  0x19   :  { %4927 = shalt.err (!%p4924_p10)
}
  0x1a   :  { %s4928_s16 = scalar_lea.vmem %s5029_s21, 1024  ;;  %p4933_p12 = scmp.lt.s32.totalorder %s5029_s21, %s5029_s21 }
  0x1b   :  { %p4929_p11 = scmp.ne.s32.totalorder %s5029_s21, %s4928_s16  ;;  %p4934_p13 = scmp.lt.s32.totalorder %s4928_s16, %s4928_s16 }
  0x1d   :  { %p4935_p0 = por %p4934_p13, %p4933_p12 }
  0x1f   :  { %p4936_p1 = pnand %p4935_p0, %p4929_p11 }
  0x21   :  { %4939 = shalt.err (!%p4936_p1)
}
  0x22   :  { %24 = dma.hbm_to_vmem [thread:$0]  %s6456_s0, 1024, %s5029_s21, [#allocation3], %s4992_s30, %s4992_s30, %s4993_s6  }
  0x23   :  { %s4994_s18 = smov [#allocation7]   ;;  %s4940_s23 = scalar_lea.hbm %s6459_s3, 6144 }
  0x24   :  { %s44_s19 = sshll.u32 %s4994_s18, 4  ;;  %p4941_p2 = scmp.ne.s32.totalorder %s6459_s3, %s4940_s23  ;;  %s45_s19 = int_to_ptr.vmem [resolvable:$true] %s44_s19 }
  0x25   :  { %p4944_p3 = scmp.lt.u32.totalorder %s4940_s23, %s6459_s3 }
  0x27   :  { %p4946_p4 = pnand %p4944_p3, %p4941_p2 }
  0x29   :  { %4949 = shalt.err (!%p4946_p4)
}
  0x2a   :  { %s4950_s28 = scalar_lea.vmem %s45_s19, 6144  ;;  %p4955_p6 = scmp.lt.s32.totalorder %s45_s19, %s45_s19 }
  0x2b   :  { %p4951_p5 = scmp.ne.s32.totalorder %s45_s19, %s4950_s28  ;;  %p4956_p7 = scmp.lt.s32.totalorder %s4950_s28, %s4950_s28 }
  0x2d   :  { %p4957_p8 = por %p4956_p7, %p4955_p6 }
  0x2f   :  { %p4958_p9 = pnand %p4957_p8, %p4951_p5 }
  0x31   :  { %4961 = shalt.err (!%p4958_p9)
}
  0x32   :  { %s4995_s0 = smov 384   ;;  %s4996_s21 = smov 24  }
  0x33   :  { %50 = dma.hbm_to_vmem [thread:$0]  %s6459_s3, 6144, %s45_s19, [#allocation6], %s4995_s0, %s4995_s0, %s4996_s21  }
  0x34   :  { %4984 = dma.done.wait [#allocation3], 1024  }
  0x35   :  { %4985 = vsyncadd [#allocation3], 4294966272 }
  0x36   :  { %4986 = dma.done.wait [#allocation6], 8192  }
  0x37   :  { %4987 = vsyncadd [#allocation6], 4294959104  ;;  %v70_v0 = vld [vmem:[#allocation5] sm:$0xff]  ;;  %v71_v1 = vld [vmem:[#allocation5 + $0x8] sm:$0xff] }
  0x38   :  { %v72_v2 = vld [vmem:[#allocation5 + $0x10] sm:$0xff]  ;;  %v87_v3 = vand.u32 4294901760, %v70_v0  ;;  %v90_v4 = vand.u32 4294901760, %v71_v1  ;;  %v73_v5 = vld [vmem:[#allocation5 + $0x18] sm:$0xff]  ;;  %v74_v7 = vld [vmem:[#allocation5 + $0x20] sm:$0xff] }
  0x39   :  { %v93_v6 = vand.u32 4294901760, %v72_v2  ;;  %v75_v8 = vld [vmem:[#allocation5 + $0x28] sm:$0xff]  ;;  %v96_v9 = vand.u32 4294901760, %v73_v5  ;;  %v99_v10 = vand.u32 4294901760, %v74_v7  ;;  %v76_v12 = vld [vmem:[#allocation5 + $0x30] sm:$0xff]  ;;  %v77_v13 = vld [vmem:[#allocation5 + $0x38] sm:$0xff] }
  0x3a   :  { %v102_v11 = vand.u32 4294901760, %v75_v8  ;;  %v5075_v14 = vpack.c.bf16 %v90_v4, %v87_v3  ;;  %v5077_v15 = vsub.f32 %v70_v0, %v87_v3  ;;  %v5079_v16 = vsub.f32 %v71_v1, %v90_v4  ;;  %v78_v25 = vld [vmem:[#allocation5 + $0x40] sm:$0xff]  ;;  %v79_v27 = vld [vmem:[#allocation5 + $0x48] sm:$0xff]  ;;  %v80_v34 = vld [vmem:[#allocation5 + $0x50] sm:$0xff] }
  0x3b   :  { %v5081_v17 = vsub.f32 %v72_v2, %v93_v6  ;;  %v5083_v18 = vpack.c.bf16 %v96_v9, %v93_v6  ;;  %v5085_v19 = vsub.f32 %v73_v5, %v96_v9  ;;  %v5087_v20 = vsub.f32 %v74_v7, %v99_v10  ;;  %v62_v35 = vld [vmem:[#allocation2] sm:$0xff]  ;;  %v81_v36 = vld [vmem:[#allocation5 + $0x58] sm:$0xff]  ;;  %v83_v45 = vld [vmem:[#allocation5 + $0x68] sm:$0xff] }
  0x3c   :  { %v4191_v21 = vpack.c.bf16 %v5079_v16, %v5077_v15  ;;  %v5091_v22 = vsub.f32 %v75_v8, %v102_v11  ;;  %v105_v23 = vand.u32 4294901760, %v76_v12  ;;  %v108_v24 = vand.u32 4294901760, %v77_v13  ;;  %4128 = vmatprep.subr.bf16.mxu1 %v5075_v14  ;;  %v82_v44 = vld [vmem:[#allocation5 + $0x60] sm:$0xff]  ;;  %v63_v48 = vld [vmem:[#allocation2 + $0x8] sm:$0xff]  ;;  %v84_v55 = vld [vmem:[#allocation5 + $0x70] sm:$0xff] }
  0x3d   :  { %v4195_v26 = vpack.c.bf16 %v5085_v19, %v5081_v17  ;;  %4130 = vmatpush3.bf16.msra.mxu1 %v5075_v14  ;;  %v5097_v28 = vpack.c.bf16 %v102_v11, %v99_v10  ;;  %v111_v29 = vand.u32 4294901760, %v78_v25  ;;  %v114_v33 = vand.u32 4294901760, %v79_v27  ;;  %v64_v56 = vld [vmem:[#allocation2 + $0x10] sm:$0xff]  ;;  %v85_v57 = vld [vmem:[#allocation5 + $0x78] sm:$0xff]  ;;  %v66_v7 = vld [vmem:[#allocation2 + $0x20] sm:$0xff] }
  0x3e   :  { %4192 = vmatprep.subr.bf16.mxu0 %v4191_v21  ;;  %4132 = vmatprep.subr.bf16.mxu1 %v5083_v18  ;;  %v4199_v30 = vpack.c.bf16 %v5091_v22, %v5087_v20  ;;  %v5102_v31 = vsub.f32 %v76_v12, %v105_v23  ;;  %v5104_v32 = vsub.f32 %v77_v13, %v108_v24  ;;  %v117_v38 = vand.u32 4294901760, %v80_v34  ;;  %v65_v1 = vld [vmem:[#allocation2 + $0x18] sm:$0xff]  ;;  %v67_v9 = vld [vmem:[#allocation2 + $0x28] sm:$0xff] }
  0x3f   :  { %4194 = vmatpush3.bf16.msra.mxu0 %v4191_v21  ;;  %v5107_v37 = vpack.c.bf16 %v108_v24, %v105_v23  ;;  %v5110_v39 = vand.u32 4294901760, %v62_v35  ;;  %v5114_v41 = vsub.f32 %v78_v25, %v111_v29  ;;  %v5116_v42 = vsub.f32 %v79_v27, %v114_v33 }
  0x40   :  { %4196 = vmatprep.subr.bf16.mxu0 %v4195_v26  ;;  %v4203_v40 = vpack.c.bf16 %v5104_v32, %v5102_v31  ;;  %v120_v43 = vand.u32 4294901760, %v81_v36  ;;  %v5122_v47 = vpack.c.bf16 %v114_v33, %v111_v29  ;;  %v5125_v49 = vsub.f32 %v80_v34, %v117_v38  ;;  %v68_v34 = vld [vmem:[#allocation2 + $0x30] sm:$0xff] }
  0x41   :  { %4134 = vmatpush3.bf16.msra.mxu1 %v5083_v18  ;;  %v5119_v46 = vsub.f32 %v62_v35, %v5110_v39  ;;  %v4207_v51 = vpack.c.bf16 %v5116_v42, %v5114_v41  ;;  %v123_v53 = vand.u32 4294901760, %v82_v44  ;;  %v126_v54 = vand.u32 4294901760, %v83_v45  ;;  %v69_v35 = vld [vmem:[#allocation2 + $0x38] sm:$0xff] }
  0x42   :  { %4136 = vmatprep.subr.bf16.mxu1 %v5097_v28  ;;  %v5131_v52 = vsub.f32 %v81_v36, %v120_v43  ;;  %v5133_v58 = vand.u32 4294901760, %v63_v48  ;;  %v250_v60 = vand.u32 4294901760, %v5077_v15  ;;  %v6469_v61 = vand.u32 4294901760, %v5079_v16 }
  0x43   :  { %4198 = vmatpush3.bf16.msra.mxu0 %v4195_v26  ;;  %3719 = vmatprep.mubr.f32.mxu0 %v5119_v46  ;;  %v169_v50 = vand.u32 4294901760, %v5119_v46  ;;  %v5141_v62 = vpack.c.bf16 %v120_v43, %v117_v38  ;;  %v129_v63 = vand.u32 4294901760, %v84_v55  ;;  %v5144_v0 = vand.u32 4294901760, %v64_v56 }
  0x44   :  { %4200 = vmatprep.subr.bf16.mxu0 %v4199_v30  ;;  %v4211_v3 = vpack.c.bf16 %v5131_v52, %v5125_v49  ;;  %v5148_v4 = vsub.f32 %v82_v44, %v123_v53  ;;  %v5150_v5 = vsub.f32 %v83_v45, %v126_v54  ;;  %v132_v6 = vand.u32 4294901760, %v85_v57 }
  0x45   :  { %4138 = vmatpush3.bf16.msra.mxu1 %v5097_v28  ;;  %v170_v59 = vsub.f32 %v5119_v46, %v169_v50  ;;  %v5153_v8 = vsub.f32 %v63_v48, %v5133_v58  ;;  %v251_v10 = vsub.f32 %v5077_v15, %v250_v60  ;;  %v258_v11 = vsub.f32 %v5079_v16, %v6469_v61 }
  0x46   :  { %4140 = vmatprep.subr.bf16.mxu1 %v5107_v37  ;;  %v6467_v12 = vand.u32 4294901760, %v5081_v17  ;;  %v5163_v13 = vpack.c.bf16 %v126_v54, %v123_v53  ;;  %v5166_v21 = vand.u32 4294901760, %v65_v1  ;;  %v6466_v23 = vand.u32 4294901760, %v5085_v19 }
  0x47   :  { %4202 = vmatpush3.bf16.msra.mxu0 %v4199_v30  ;;  %v171_v2 = vand.u32 4294901760, %v170_v59  ;;  %v5169_v24 = vsub.f32 %v84_v55, %v129_v63  ;;  %v5172_v25 = vsub.f32 %v64_v56, %v5144_v0  ;;  %v5174_v26 = vand.u32 4294901760, %v66_v7 }
  0x48   :  { %4204 = vmatprep.subr.bf16.mxu0 %v4203_v40  ;;  %v6463_v27 = vand.u32 4294901760, %v5153_v8  ;;  %v4215_v29 = vpack.c.bf16 %v5150_v5, %v5148_v4  ;;  %v5179_v30 = vsub.f32 %v85_v57, %v132_v6  ;;  %v5181_v33 = vand.u32 4294901760, %v67_v9 }
  0x49   :  { %4142 = vmatpush3.bf16.msra.mxu1 %v5107_v37  ;;  %3631 = vmatprep.mubr.f32.mxu1 %v171_v2  ;;  %v6462_v36 = vand.u32 4294901760, %v5087_v20  ;;  %v252_v38 = vand.u32 4294901760, %v251_v10  ;;  %v265_v43 = vsub.f32 %v5081_v17, %v6467_v12  ;;  %v6464_v44 = vand.u32 4294901760, %v5172_v25 }
  0x4a   :  { %4144 = vmatprep.subr.bf16.mxu1 %v5122_v47  ;;  %v5189_v45 = vpack.c.bf16 %v132_v6, %v129_v63  ;;  %v5192_v48 = vsub.f32 %v65_v1, %v5166_v21  ;;  %v6465_v53 = vand.u32 4294901760, %v5091_v22  ;;  %v5200_v54 = vsub.f32 %v66_v7, %v5174_v26 }
  0x4b   :  { %4206 = vmatpush3.bf16.msra.mxu0 %v4203_v40  ;;  %v259_v40 = vand.u32 4294901760, %v258_v11  ;;  %v5202_v55 = vand.u32 4294901760, %v68_v34  ;;  %v5204_v56 = vand.u32 4294901760, %v69_v35  ;;  %v180_v57 = vsub.f32 %v5153_v8, %v6463_v27 }
  0x4c   :  { %4208 = vmatprep.subr.bf16.mxu0 %v4207_v51  ;;  %v4219_v59 = vpack.c.bf16 %v5179_v30, %v5169_v24  ;;  %v5212_v63 = vsub.f32 %v67_v9, %v5181_v33  ;;  %v279_v1 = vsub.f32 %v5087_v20, %v6462_v36  ;;  %v6468_v2 = vand.u32 4294901760, %v5192_v48 }
  0x4d   :  { %4146 = vmatpush3.bf16.msra.mxu1 %v5122_v47  ;;  %v266_v6 = vand.u32 4294901760, %v265_v43  ;;  %v190_v7 = vsub.f32 %v5172_v25, %v6464_v44  ;;  %v6470_v10 = vand.u32 4294901760, %v5200_v54  ;;  %v286_v11 = vsub.f32 %v5091_v22, %v6465_v53 }
  0x4e   :  { %4148 = vmatprep.subr.bf16.mxu1 %v5141_v62  ;;  %v292_v36 = vand.u32 4294901760, %v5102_v31  ;;  %v6473_v27 = vand.u32 4294901760, %v5104_v32  ;;  %v181_v43 = vand.u32 4294901760, %v180_v57  ;;  %v280_v44 = vand.u32 4294901760, %v279_v1 }
  0x4f   :  { %4210 = vmatpush3.bf16.msra.mxu0 %v4207_v51  ;;  %v272_v51 = vsub.f32 %v5085_v19, %v6466_v23  ;;  %v200_v53 = vsub.f32 %v5192_v48, %v6468_v2  ;;  %v6472_v23 = vand.u32 4294901760, %v5212_v63  ;;  %v287_v12 = vand.u32 4294901760, %v286_v11 }
  0x50   :  { %4212 = vmatprep.subr.bf16.mxu0 %v4211_v3  ;;  %v293_v2 = vsub.f32 %v5102_v31, %v292_v36  ;;  %v300_v61 = vsub.f32 %v5104_v32, %v6473_v27  ;;  %v6637_v46 = vand.u32 4294901760, %v5079_v16  ;;  %v6641_v15 = vand.u32 4294901760, %v5172_v25 }
  0x51   :  { %4150 = vmatpush3.bf16.msra.mxu1 %v5141_v62  ;;  %v273_v9 = vand.u32 4294901760, %v272_v51  ;;  %v6471_v51 = vand.u32 4294901760, %v5114_v41  ;;  %v6642_v16 = vand.u32 4294901760, %v5087_v20 }
  0x52   :  { %4152 = vmatprep.subr.bf16.mxu1 %v5163_v13  ;;  %v301_v27 = vand.u32 4294901760, %v300_v61 }
  0x53   :  { %4214 = vmatpush3.bf16.msra.mxu0 %v4211_v3  ;;  %v4159_v3 = vpack.c.bf16 %v259_v40, %v252_v38  ;;  %v5230_v38 = vsub.f32 %v68_v34, %v5202_v55  ;;  %v5233_v40 = vsub.f32 %v69_v35, %v5204_v56  ;;  %v191_v34 = vand.u32 4294901760, %v190_v7 }
  0x54   :  { %4216 = vmatprep.subr.bf16.mxu0 %v4215_v29  ;;  %v210_v35 = vsub.f32 %v5200_v54, %v6470_v10  ;;  %v4163_v1 = vpack.c.bf16 %v273_v9, %v266_v6  ;;  %v307_v7 = vsub.f32 %v5114_v41, %v6471_v51  ;;  %v201_v10 = vand.u32 4294901760, %v200_v53 }
  0x55   :  { %4154 = vmatpush3.bf16.msra.mxu1 %v5163_v13  ;;  %v6475_v57 = vand.u32 4294901760, %v5230_v38  ;;  %v220_v6 = vsub.f32 %v5212_v63, %v6472_v23  ;;  %v239_v9 = vand.u32 4294901760, %v5233_v40  ;;  %v4167_v53 = vpack.c.bf16 %v287_v12, %v280_v44 }
  0x56   :  { %4156 = vmatprep.subr.bf16.mxu1 %v5189_v45  ;;  %v294_v23 = vand.u32 4294901760, %v293_v2  ;;  %v334_v12 = vand.u32 4294901760, %v5148_v4 }
  0x57   :  { %4218 = vmatpush3.bf16.msra.mxu0 %v4215_v29  ;;  %v6474_v29 = vand.u32 4294901760, %v5116_v42  ;;  %v230_v51 = vsub.f32 %v5230_v38, %v6475_v57 }
  0x58   :  { %4220 = vmatprep.subr.bf16.mxu0 %v4219_v59  ;;  %v4171_v2 = vpack.c.bf16 %v301_v27, %v294_v23  ;;  %v335_v23 = vsub.f32 %v5148_v4, %v334_v12 }
  0x59   :  { %4158 = vmatpush3.bf16.msra.mxu1 %v5189_v45  ;;  %v314_v11 = vsub.f32 %v5116_v42, %v6474_v29  ;;  %v240_v29 = vsub.f32 %v5233_v40, %v239_v9  ;;  %v231_v44 = vand.u32 4294901760, %v230_v51 }
  0x5a   :  { %4160 = vmatprep.subr.bf16.mxu1 %v4159_v3 }
  0x5b   :  { %4222 = vmatpush3.bf16.msra.mxu0 %v4219_v59  ;;  %v320_v59 = vand.u32 4294901760, %v5125_v49  ;;  %v315_v57 = vand.u32 4294901760, %v314_v11 }
  0x5c   :  { %4224 = vmatprep.subr.bf16.mxu0 %v5075_v14  ;;  %3632 = vmatmul.mubr.f32.vlgmr.msra.gmra.mrb[0].mxu1 %v181_v43  ;;  %v211_v43 = vand.u32 4294901760, %v210_v35  ;;  %v221_v35 = vand.u32 4294901760, %v220_v6 }
  0x5d   :  { %4162 = vmatpush3.bf16.msra.mxu1 %v4159_v3  ;;  %3634 = vmatprep.mubr.f32.mxu1 %v191_v34  ;;  %v327_v3 = vand.u32 4294901760, %v5131_v52  ;;  %v308_v34 = vand.u32 4294901760, %v307_v7  ;;  %v321_v61 = vsub.f32 %v5125_v49, %v320_v59  ;;  %v341_v7 = vand.u32 4294901760, %v5150_v5 }
  0x5e   :  { %3720 = vmatmul.mubr.f32.vlgmr.msra.gmra.mrb[0].mxu0 %v5153_v8  ;;  %4164 = vmatprep.subr.bf16.mxu1 %v4163_v1 }
  0x5f   :  { %4226 = vmatpush3.bf16.msra.mxu0 %v5075_v14  ;;  %3722 = vmatprep.mubr.f32.mxu0 %v5172_v25  ;;  %v4175_v51 = vpack.c.bf16 %v315_v57, %v308_v34  ;;  %v322_v6 = vand.u32 4294901760, %v321_v61  ;;  %v342_v11 = vsub.f32 %v5150_v5, %v341_v7  ;;  %v336_v57 = vand.u32 4294901760, %v335_v23  ;;  %v1063_v5 = vld [vmem:[#allocation7 + $0x8] sm:$0xff] }
  0x60   :  { %4228 = vmatprep.subr.bf16.mxu0 %v5083_v18  ;;  %3635 = vmatmul.mubr.f32.gmra.mrb[2].mxu1 %v201_v10  ;;  %v328_v10 = vsub.f32 %v5131_v52, %v327_v3  ;;  %v6646_v25 = vand.u32 4294901760, %v5104_v32  ;;  %v4275_v32 = vpack.c.bf16 %v327_v3, %v320_v59 }
  0x61   :  { %4166 = vmatpush3.bf16.msra.mxu1 %v4163_v1  ;;  %3637 = vmatprep.mubr.f32.mxu1 %v211_v43  ;;  %v241_v1 = vand.u32 4294901760, %v240_v29  ;;  %v348_v43 = vand.u32 4294901760, %v5169_v24  ;;  %v355_v29 = vand.u32 4294901760, %v5179_v30  ;;  %v343_v34 = vand.u32 4294901760, %v342_v11 }
  0x62   :  { %3723 = vmatmul.mubr.f32.gmra.mrb[2].mxu0 %v5192_v48  ;;  %4168 = vmatprep.subr.bf16.mxu1 %v4167_v53  ;;  %v329_v27 = vand.u32 4294901760, %v328_v10  ;;  %v4267_v20 = vpack.c.bf16 %v6646_v25, %v292_v36  ;;  %v6650_v11 = vand.u32 4294901760, %v5116_v42  ;;  %v1065_v36 = vld [vmem:[#allocation7 + $0x18] sm:$0xff] }
  0x63   :  { %4230 = vmatpush3.bf16.msra.mxu0 %v5083_v18  ;;  %3725 = vmatprep.mubr.f32.mxu0 %v5200_v54  ;;  %v356_v61 = vsub.f32 %v5179_v30, %v355_v29  ;;  %v4283_v42 = vpack.c.bf16 %v355_v29, %v348_v43 }
  0x64   :  { %4232 = vmatprep.subr.bf16.mxu0 %v5097_v28  ;;  %3638 = vmatmul.mubr.f32.gmra.mrb[4].mxu1 %v221_v35  ;;  %v349_v35 = vsub.f32 %v5169_v24, %v348_v43 }
  0x65   :  { %4170 = vmatpush3.bf16.msra.mxu1 %v4167_v53  ;;  %3640 = vmatprep.mubr.f32.mxu1 %v231_v44  ;;  %v4179_v53 = vpack.c.bf16 %v329_v27, %v322_v6  ;;  %v4183_v44 = vpack.c.bf16 %v343_v34, %v336_v57  ;;  %v357_v10 = vand.u32 4294901760, %v356_v61  ;;  %v6639_v6 = vand.u32 4294901760, %v5085_v19 }
  0x66   :  { %3726 = vmatmul.mubr.f32.gmra.mrb[4].mxu0 %v5212_v63  ;;  %4172 = vmatprep.subr.bf16.mxu1 %v4171_v2  ;;  %v6640_v27 = vand.u32 4294901760, %v5153_v8  ;;  %v6644_v19 = vand.u32 4294901760, %v5192_v48  ;;  %v6645_v8 = vand.u32 4294901760, %v5200_v54  ;;  %v6648_v48 = vand.u32 4294901760, %v5230_v38 }
  0x67   :  { %4234 = vmatpush3.bf16.msra.mxu0 %v5097_v28  ;;  %3728 = vmatprep.mubr.f32.mxu0 %v5230_v38  ;;  %v6649_v54 = vand.u32 4294901760, %v5114_v41  ;;  %v4279_v41 = vpack.c.bf16 %v341_v7, %v334_v12  ;;  %v1076_v38 = vld [vmem:[#allocation7 + $0x70] sm:$0xff]  ;;  %v1133_v57 = vand.u32 4294901760, %v1065_v36 }
  0x68   :  { %4236 = vmatprep.subr.bf16.mxu0 %v5107_v37  ;;  %3641 = vmatmul.mubr.f32.gmra.mrb[6].mxu1 %v241_v1 }
  0x69   :  { %4174 = vmatpush3.bf16.msra.mxu1 %v4171_v2  ;;  %3675 = vmatprep.mubr.f32.mxu1 %v5110_v39  ;;  %v350_v2 = vand.u32 4294901760, %v349_v35  ;;  %v4271_v31 = vpack.c.bf16 %v6650_v11, %v6649_v54  ;;  %v2338_v35 = vand.u32 4294901760, %v1076_v38  ;;  %v1082_v54 = vld [vmem:[#allocation7 + $0xa0] sm:$0xff]  ;;  %v1085_v11 = vld [vmem:[#allocation7 + $0xb8] sm:$0xff] }
  0x6a   :  { %3729 = vmatmul.mubr.f32.gmra.mrb[6].mxu0 %v5233_v40  ;;  %4176 = vmatprep.subr.bf16.mxu1 %v4175_v51  ;;  %v1079_v40 = vld [vmem:[#allocation7 + $0x88] sm:$0xff] }
  0x6b   :  { %4238 = vmatpush3.bf16.msra.mxu0 %v5107_v37  ;;  %3763 = vmatprep.mubr.f32.mxu0 %v169_v50  ;;  %v4187_v1 = vpack.c.bf16 %v357_v10, %v350_v2  ;;  %v4255_v50 = vpack.c.bf16 %v6637_v46, %v250_v60  ;;  %v6643_v60 = vand.u32 4294901760, %v5091_v22  ;;  %v6647_v22 = vand.u32 4294901760, %v5212_v63  ;;  %v1072_v2 = vld [vmem:[#allocation7 + $0x50] sm:$0xff] }
  0x6c   :  { %4240 = vmatprep.subr.bf16.mxu0 %v5122_v47  ;;  %v2341_v61 = vand.u32 4294901760, %v1079_v40 }
  0x6d   :  { %4178 = vmatpush3.bf16.msra.mxu1 %v4175_v51  ;;  %v6638_v51 = vand.u32 4294901760, %v5081_v17  ;;  %v4263_v17 = vpack.c.bf16 %v6643_v60, %v6642_v16  ;;  %v5446_v16 = vsub.f32 %v1076_v38, %v2338_v35 }
  0x6e   :  { %4180 = vmatprep.subr.bf16.mxu1 %v4179_v53 }
  0x6f   :  { %4242 = vmatpush3.bf16.msra.mxu0 %v5122_v47  ;;  %v4259_v23 = vpack.c.bf16 %v6639_v6, %v6638_v51  ;;  %v1068_v51 = vld [vmem:[#allocation7 + $0x30] sm:$0xff]  ;;  %v1071_v6 = vld [vmem:[#allocation7 + $0x48] sm:$0xff]  ;;  %6660 = vst [vmem:[#allocation21_spill] sm:$0xff] %v5446_v16 }
  0x70   :  { %4244 = vmatprep.subr.bf16.mxu0 %v5141_v62 }
  0x71   :  { %4182 = vmatpush3.bf16.msra.mxu1 %v4179_v53 }
  0x72   :  { %4184 = vmatprep.subr.bf16.mxu1 %v4183_v44 }
  0x73   :  { %4246 = vmatpush3.bf16.msra.mxu0 %v5141_v62 }
  0x74   :  { %4248 = vmatprep.subr.bf16.mxu0 %v5163_v13 }
  0x75   :  { %4186 = vmatpush3.bf16.msra.mxu1 %v4183_v44  ;;  %v1069_v44 = vld [vmem:[#allocation7 + $0x38] sm:$0xff] }
  0x76   :  { %4188 = vmatprep.subr.bf16.mxu1 %v4187_v1 }
  0x77   :  { %4250 = vmatpush3.bf16.msra.mxu0 %v5163_v13 }
  0x78   :  { %4252 = vmatprep.subr.bf16.mxu0 %v5189_v45 }
  0x79   :  { %4190 = vmatpush3.bf16.msra.mxu1 %v4187_v1 }
  0x7b   :  { %4254 = vmatpush3.bf16.msra.mxu0 %v5189_v45 }
  0x7c   :  { %4256 = vmatprep.subr.bf16.mxu0 %v4255_v50  ;;  %3676 = vmatmul.mubr.f32.vlgmr.msra.gmra.mrb[0].mxu1 %v5133_v58 }
  0x7d   :  { %3678 = vmatprep.mubr.f32.mxu1 %v5144_v0 }
  0x7e   :  { %3764 = vmatmul.mubr.f32.vlgmr.msra.gmra.mrb[0].mxu0 %v6640_v27  ;;  %v5442_v27 = vsub.f32 %v1065_v36, %v1133_v57 }
  0x7f   :  { %4258 = vmatpush3.bf16.msra.mxu0 %v4255_v50  ;;  %3766 = vmatprep.mubr.f32.mxu0 %v6641_v15  ;;  %v5444_v15 = vpack.c.bf16 %v2341_v61, %v2338_v35  ;;  %v1081_v35 = vld [vmem:[#allocation7 + $0x98] sm:$0xff] }
  0x80   :  { %4260 = vmatprep.subr.bf16.mxu0 %v4259_v23  ;;  %3679 = vmatmul.mubr.f32.gmra.mrb[2].mxu1 %v5166_v21 }
  0x81   :  { %3681 = vmatprep.mubr.f32.mxu1 %v5174_v26  ;;  %6659 = vst [vmem:[#allocation20_spill] sm:$0xff] %v5444_v15 }
  0x82   :  { %3767 = vmatmul.mubr.f32.gmra.mrb[2].mxu0 %v6644_v19  ;;  %v1135_v19 = vand.u32 4294901760, %v1069_v44 }
  0x83   :  { %4262 = vmatpush3.bf16.msra.mxu0 %v4259_v23  ;;  %3769 = vmatprep.mubr.f32.mxu0 %v6645_v8  ;;  %v1139_v8 = vand.u32 4294901760, %v1072_v2 }
  0x84   :  { %4264 = vmatprep.subr.bf16.mxu0 %v4263_v17  ;;  %3682 = vmatmul.mubr.f32.gmra.mrb[4].mxu1 %v5181_v33 }
  0x85   :  { %3684 = vmatprep.mubr.f32.mxu1 %v5202_v55 }
  0x86   :  { %3770 = vmatmul.mubr.f32.gmra.mrb[4].mxu0 %v6647_v22  ;;  %v1137_v22 = vand.u32 4294901760, %v1068_v51 }
  0x87   :  { %4266 = vmatpush3.bf16.msra.mxu0 %v4263_v17  ;;  %3772 = vmatprep.mubr.f32.mxu0 %v6648_v48  ;;  %v5449_v17 = vsub.f32 %v1079_v40, %v2341_v61  ;;  %v1141_v48 = vand.u32 4294901760, %v1071_v6 }
  0x88   :  { %4268 = vmatprep.subr.bf16.mxu0 %v4267_v20  ;;  %3685 = vmatmul.mubr.f32.gmra.mrb[6].mxu1 %v5204_v56 }
  0x89   :  { %6661 = vst [vmem:[#allocation22_spill] sm:$0xff] %v5449_v17 }
  0x8a   :  { %3773 = vmatmul.mubr.f32.gmra.mrb[6].mxu0 %v239_v9 }
  0x8b   :  { %4270 = vmatpush3.bf16.msra.mxu0 %v4267_v20  ;;  %3807 = vmatprep.mubr.f32.mxu0 %v5110_v39  ;;  %v6483_v20 = vand.u32 4294901760, %v5446_v16 }
  0x8c   :  { %4272 = vmatprep.subr.bf16.mxu0 %v4271_v31 }
  0x8f   :  { %4274 = vmatpush3.bf16.msra.mxu0 %v4271_v31  ;;  %v1075_v31 = vld [vmem:[#allocation7 + $0x68] sm:$0xff] }
  0x90   :  { %4276 = vmatprep.subr.bf16.mxu0 %v4275_v32 }
  0x93   :  { %4278 = vmatpush3.bf16.msra.mxu0 %v4275_v32  ;;  %v6482_v32 = vand.u32 4294901760, %v5449_v17 }
  0x94   :  { %4280 = vmatprep.subr.bf16.mxu0 %v4279_v41 }
  0x97   :  { %4282 = vmatpush3.bf16.msra.mxu0 %v4279_v41  ;;  %v5453_v41 = vpack.c.bf16 %v1139_v8, %v1135_v19 }
  0x98   :  { %4284 = vmatprep.subr.bf16.mxu0 %v4283_v42 }
  0x99   :  { %6662 = vst [vmem:[#allocation23_spill] sm:$0xff] %v5453_v41 }
  0x9b   :  { %4286 = vmatpush3.bf16.msra.mxu0 %v4283_v42  ;;  %v5455_v42 = vsub.f32 %v1069_v44, %v1135_v19 }
  0x9c   :  { %4288 = vmatprep.subr.bf16.mxu0 %v5075_v14 }
  0x9e   :  { %3808 = vmatmul.mubr.f32.vlgmr.msra.gmra.mrb[0].mxu0 %v5133_v58 }
  0x9f   :  { %4290 = vmatpush3.bf16.msra.mxu0 %v5075_v14  ;;  %3810 = vmatprep.mubr.f32.mxu0 %v5144_v0  ;;  %v1064_v14 = vld [vmem:[#allocation7 + $0x10] sm:$0xff] }
  0xa0   :  { %4292 = vmatprep.subr.bf16.mxu0 %v5083_v18 }
  0xa2   :  { %3811 = vmatmul.mubr.f32.gmra.mrb[2].mxu0 %v5166_v21 }
  0xa3   :  { %4294 = vmatpush3.bf16.msra.mxu0 %v5083_v18  ;;  %3813 = vmatprep.mubr.f32.mxu0 %v5174_v26  ;;  %v1067_v18 = vld [vmem:[#allocation7 + $0x28] sm:$0xff] }
  0xa4   :  { %4296 = vmatprep.subr.bf16.mxu0 %v5097_v28 }
  0xa6   :  { %3814 = vmatmul.mubr.f32.gmra.mrb[4].mxu0 %v5181_v33 }
  0xa7   :  { %4298 = vmatpush3.bf16.msra.mxu0 %v5097_v28  ;;  %3816 = vmatprep.mubr.f32.mxu0 %v5202_v55  ;;  %v1070_v28 = vld [vmem:[#allocation7 + $0x40] sm:$0xff] }
  0xa8   :  { %4300 = vmatprep.subr.bf16.mxu0 %v5107_v37  ;;  %v2332_v49 = vand.u32 4294901760, %v1070_v28 }
  0xaa   :  { %3817 = vmatmul.mubr.f32.gmra.mrb[6].mxu0 %v5204_v56  ;;  %v5409_v4 = vsub.f32 %v1070_v28, %v2332_v49  ;;  %v1074_v28 = vld [vmem:[#allocation7 + $0x60] sm:$0xff] }
  0xab   :  { %4302 = vmatpush3.bf16.msra.mxu0 %v5107_v37  ;;  %3851 = vmatprep.mubr.f32.mxu0 %v5110_v39  ;;  %v2326_v37 = vand.u32 4294901760, %v1064_v14  ;;  %v2329_v39 = vand.u32 4294901760, %v1067_v18 }
  0xac   :  { %4304 = vmatprep.subr.bf16.mxu0 %v5122_v47  ;;  %6654 = vst [vmem:[#allocation15_spill] sm:$0xff] %v5409_v4 }
  0xaf   :  { %4306 = vmatpush3.bf16.msra.mxu0 %v5122_v47  ;;  %v1073_v47 = vld [vmem:[#allocation7 + $0x58] sm:$0xff] }
  0xb0   :  { %4308 = vmatprep.subr.bf16.mxu0 %v5141_v62  ;;  %v2335_v52 = vand.u32 4294901760, %v1073_v47 }
  0xb2   :  { %v5413_v24 = vsub.f32 %v1073_v47, %v2335_v52  ;;  %v5462_v47 = vpack.c.bf16 %v1141_v48, %v1137_v22 }
  0xb3   :  { %4310 = vmatpush3.bf16.msra.mxu0 %v5141_v62  ;;  %v5405_v62 = vsub.f32 %v1064_v14, %v2326_v37  ;;  %v5457_v14 = vsub.f32 %v1072_v2, %v1139_v8 }
  0xb4   :  { %4312 = vmatprep.subr.bf16.mxu0 %v5163_v13  ;;  %6656 = vst [vmem:[#allocation17_spill] sm:$0xff] %v5413_v24  ;;  %v6484_v9 = vand.u32 4294901760, %v5413_v24  ;;  %6663 = vst [vmem:[#allocation24_spill] sm:$0xff] %v5462_v47 }
  0xb5   :  { %6652 = vst [vmem:[#allocation13_spill] sm:$0xff] %v5405_v62 }
  0xb6   :  { %v2511_v53 = vsub.f32 %v5413_v24, %v6484_v9 }
  0xb7   :  { %4314 = vmatpush3.bf16.msra.mxu0 %v5163_v13  ;;  %v1066_v13 = vld [vmem:[#allocation7 + $0x20] sm:$0xff] }
  0xb8   :  { %4316 = vmatprep.subr.bf16.mxu0 %v5189_v45  ;;  %v1131_v30 = vand.u32 4294901760, %v1066_v13  ;;  %v2512_v23 = vand.u32 4294901760, %v2511_v53  ;;  %v1091_v53 = vld [vmem:[#allocation7 + $0xe8] sm:$0xff] }
  0xb9   :  { %v2353_v8 = vand.u32 4294901760, %v1091_v53 }
  0xba   :  { %v5423_v12 = vsub.f32 %v1066_v13, %v1131_v30  ;;  %v2344_v13 = vand.u32 4294901760, %v1082_v54 }
  0xbb   :  { %4318 = vmatpush3.bf16.msra.mxu0 %v5189_v45  ;;  %v6487_v45 = vand.u32 4294901760, %v5405_v62 }
  0xbd   :  { %v2490_v7 = vsub.f32 %v5405_v62, %v6487_v45 }
  0xbe   :  { %3852 = vmatmul.mubr.f32.vlgmr.msra.gmra.mrb[0].mxu0 %v5133_v58  ;;  %v5403_v58 = vpack.c.bf16 %v2329_v39, %v2326_v37  ;;  %v1077_v37 = vld [vmem:[#allocation7 + $0x78] sm:$0xff] }
  0xbf   :  { %3854 = vmatprep.mubr.f32.mxu0 %v5144_v0  ;;  %v5407_v0 = vsub.f32 %v1067_v18, %v2329_v39  ;;  %v2491_v10 = vand.u32 4294901760, %v2490_v7  ;;  %v1078_v18 = vld [vmem:[#allocation7 + $0x80] sm:$0xff]  ;;  %v2518_v39 = vsub.f32 %v5446_v16, %v6483_v20  ;;  %v1149_v38 = vand.u32 4294901760, %v1077_v37 }
  0xc0   :  { %6651 = vst [vmem:[#allocation12_spill] sm:$0xff] %v5403_v58  ;;  %v1147_v36 = vand.u32 4294901760, %v1078_v18 }
  0xc1   :  { %6653 = vst [vmem:[#allocation14_spill] sm:$0xff] %v5407_v0 }
  0xc2   :  { %3855 = vmatmul.mubr.f32.gmra.mrb[2].mxu0 %v5166_v21  ;;  %v5411_v21 = vpack.c.bf16 %v2335_v52, %v2332_v49  ;;  %v5464_v49 = vsub.f32 %v1068_v51, %v1137_v22  ;;  %v5466_v52 = vsub.f32 %v1071_v6, %v1141_v48  ;;  %v5483_v2 = vsub.f32 %v1078_v18, %v1147_v36 }
  0xc3   :  { %3857 = vmatprep.mubr.f32.mxu0 %v5174_v26  ;;  %v1127_v26 = vand.u32 4294901760, %v1063_v5  ;;  %v5505_v18 = vsub.f32 %v1091_v53, %v2353_v8  ;;  %v5522_v53 = vld [vmem:[#allocation7 + $0x100] sm:$0xff] }
  0xc4   :  { %6655 = vst [vmem:[#allocation16_spill] sm:$0xff] %v5411_v21 }
  0xc5   :  { %v5419_v59 = vpack.c.bf16 %v1131_v30, %v1127_v26  ;;  %v5421_v3 = vsub.f32 %v1063_v5, %v1127_v26  ;;  %v2525_v5 = vsub.f32 %v5449_v17, %v6482_v32  ;;  %v2347_v26 = vand.u32 4294901760, %v1085_v11  ;;  %6671 = vst [vmem:[#allocation32_spill] sm:$0xff] %v5505_v18  ;;  %v1101_v17 = vld [vmem:[#allocation7 + $0x138] sm:$0xff] }
  0xc6   :  { %3858 = vmatmul.mubr.f32.gmra.mrb[4].mxu0 %v5181_v33  ;;  %v1062_v33 = vld [vmem:[#allocation7] sm:$0xff]  ;;  %v1143_v30 = vand.u32 4294901760, %v1075_v31 }
  0xc7   :  { %3860 = vmatprep.mubr.f32.mxu0 %v5202_v55  ;;  %v6486_v55 = vand.u32 4294901760, %v5407_v0  ;;  %v1129_v63 = vand.u32 4294901760, %v1062_v33  ;;  %6657 = vst [vmem:[#allocation18_spill] sm:$0xff] %v5419_v59  ;;  %4320 = vmatprep.subr.bf16.mxu1 %v5419_v59  ;;  %v2526_v40 = vand.u32 4294901760, %v2525_v5  ;;  %v5473_v7 = vpack.c.bf16 %v2347_v26, %v2344_v13 }
  0xc8   :  { %v5479_v61 = vpack.c.bf16 %v1147_v36, %v1143_v30  ;;  %v5481_v44 = vsub.f32 %v1075_v31, %v1143_v30  ;;  %v6476_v30 = vand.u32 4294901760, %v5505_v18 }
  0xc9   :  { %v2497_v43 = vsub.f32 %v5407_v0, %v6486_v55  ;;  %v5438_v34 = vsub.f32 %v1062_v33, %v1129_v63  ;;  %v5440_v50 = vpack.c.bf16 %v1133_v57, %v1129_v63  ;;  %v2519_v33 = vand.u32 4294901760, %v2518_v39  ;;  %6664 = vst [vmem:[#allocation25_spill] sm:$0xff] %v5473_v7  ;;  %v1088_v57 = vld [vmem:[#allocation7 + $0xd0] sm:$0xff] }
  0xca   :  { %3861 = vmatmul.mubr.f32.gmra.mrb[6].mxu0 %v5204_v56  ;;  %v6485_v56 = vand.u32 4294901760, %v5409_v4  ;;  %v1145_v63 = vand.u32 4294901760, %v1074_v28  ;;  %6667 = vst [vmem:[#allocation28_spill] sm:$0xff] %v5479_v61  ;;  %v2350_v19 = vand.u32 4294901760, %v1088_v57 }
  0xcb   :  { %v2498_v1 = vand.u32 4294901760, %v2497_v43  ;;  %6658 = vst [vmem:[#allocation19_spill] sm:$0xff] %v5440_v50  ;;  %4322 = vmatpush1.bf16.msra.mxu1 %v5440_v50  ;;  %v5475_v43 = vsub.f32 %v1082_v54, %v2344_v13 }
  0xcc   :  { %v2504_v29 = vsub.f32 %v5409_v4, %v6485_v56  ;;  %4324 = vmatprep.subr.bf16.mxu1 %v5453_v41  ;;  %v5503_v31 = vsub.f32 %v1088_v57, %v2350_v19 }
  0xcd   :  { %v4543_v60 = vpack.c.bf16 %v2498_v1, %v2491_v10  ;;  %6665 = vst [vmem:[#allocation26_spill] sm:$0xff] %v5475_v43  ;;  %v5485_v10 = vpack.c.bf16 %v1149_v38, %v1145_v63  ;;  %v1084_v1 = vld [vmem:[#allocation7 + $0xb0] sm:$0xff]  ;;  %v6481_v51 = vand.u32 4294901760, %v5475_v43 }
  0xce   :  { %v2505_v46 = vand.u32 4294901760, %v2504_v29  ;;  %v5477_v29 = vsub.f32 %v1085_v11, %v2347_v26  ;;  %v1155_v54 = vand.u32 4294901760, %v1084_v1  ;;  %v5501_v11 = vpack.c.bf16 %v2353_v8, %v2350_v19  ;;  %6670 = vst [vmem:[#allocation31_spill] sm:$0xff] %v5503_v31 }
  0xcf   :  { %4544 = vmatprep.subr.bf16.mxu0 %v4543_v60  ;;  %4326 = vmatpush1.bf16.msra.mxu1 %v5462_v47  ;;  %6668 = vst [vmem:[#allocation29_spill] sm:$0xff] %v5485_v10  ;;  %v2532_v22 = vsub.f32 %v5475_v43, %v6481_v51  ;;  %v6478_v26 = vand.u32 4294901760, %v5503_v31  ;;  %v1098_v43 = vld [vmem:[#allocation7 + $0x120] sm:$0xff] }
  0xd0   :  { %v4547_v25 = vpack.c.bf16 %v2512_v23, %v2505_v46  ;;  %4546 = vmatpush3.bf16.msra.mxu0 %v4543_v60  ;;  %6666 = vst [vmem:[#allocation27_spill] sm:$0xff] %v5477_v29  ;;  %v4551_v46 = vpack.c.bf16 %v2526_v40, %v2519_v33  ;;  %v6480_v6 = vand.u32 4294901760, %v5477_v29  ;;  %v5489_v23 = vsub.f32 %v1074_v28, %v1145_v63 }
  0xd1   :  { %4328 = vmatprep.subr.bf16.mxu1 %v5479_v61  ;;  %v5492_v60 = vsub.f32 %v1077_v37, %v1149_v38  ;;  %6669 = vst [vmem:[#allocation30_spill] sm:$0xff] %v5501_v11  ;;  %v2533_v37 = vand.u32 4294901760, %v2532_v22  ;;  %v5511_v13 = vsub.f32 %v1084_v1, %v1155_v54  ;;  %v2546_v36 = vsub.f32 %v5503_v31, %v6478_v26  ;;  %v5540_v22 = vld [vmem:[#allocation7 + $0x148] sm:$0xff]  ;;  %v1102_v31 = vld [vmem:[#allocation7 + $0x140] sm:$0xff] }
  0xd2   :  { %4548 = vmatprep.subr.bf16.mxu0 %v4547_v25  ;;  %v2539_v48 = vsub.f32 %v5477_v29, %v6480_v6  ;;  %v2553_v63 = vsub.f32 %v5505_v18, %v6476_v30  ;;  %v6493_v1 = vand.u32 4294901760, %v5522_v53  ;;  %v5566_v30 = vld [vmem:[#allocation7 + $0x90] sm:$0xff]  ;;  %v1179_v29 = vand.u32 4294901760, %v1102_v31 }
  0xd3   :  { %4330 = vmatpush1.bf16.msra.mxu1 %v5485_v10  ;;  %v2547_v38 = vand.u32 4294901760, %v2546_v36  ;;  %v1153_v32 = vand.u32 4294901760, %v5566_v30 }
  0xd4   :  { %4550 = vmatpush3.bf16.msra.mxu0 %v4547_v25  ;;  %v1151_v25 = vand.u32 4294901760, %v1081_v35  ;;  %v2540_v39 = vand.u32 4294901760, %v2539_v48  ;;  %v2554_v40 = vand.u32 4294901760, %v2553_v63  ;;  %v5531_v19 = vsub.f32 %v5522_v53, %v6493_v1  ;;  %v5602_v1 = vld [vmem:[#allocation7 + $0xd8] sm:$0xff] }
  0xd5   :  { %4552 = vmatprep.subr.bf16.mxu0 %v4551_v46  ;;  %v1165_v61 = vand.u32 4294901760, %v5602_v1 }
  0xd6   :  { %v5507_v28 = vsub.f32 %v1081_v35, %v1151_v25  ;;  %v5509_v5 = vpack.c.bf16 %v1155_v54, %v1151_v25  ;;  %v4555_v33 = vpack.c.bf16 %v2540_v39, %v2533_v37  ;;  %v4559_v57 = vpack.c.bf16 %v2554_v40, %v2547_v38  ;;  %v5524_v35 = vld [vmem:[#allocation7 + $0x118] sm:$0xff]  ;;  %6673 = vst [vmem:[#allocation34_spill] sm:$0xff] %v5531_v19  ;;  %v5538_v25 = vld [vmem:[#allocation7 + $0x130] sm:$0xff]  ;;  %v5562_v40 = vld [vmem:[#allocation7 + $0x160] sm:$0xff] }
  0xd7   :  { %v6477_v48 = vand.u32 4294901760, %v5531_v19  ;;  %v6489_v37 = vand.u32 4294901760, %v5538_v25  ;;  %v6488_v39 = vand.u32 4294901760, %v5540_v22  ;;  %v6498_v9 = vand.u32 4294901760, %v5562_v40 }
  0xd8   :  { %4554 = vmatpush3.bf16.msra.mxu0 %v4551_v46  ;;  %6672 = vst [vmem:[#allocation33_spill] sm:$0xff] %v5509_v5  ;;  %4332 = vmatprep.subr.bf16.mxu1 %v5509_v5  ;;  %v6490_v46 = vand.u32 4294901760, %v5524_v35  ;;  %v5670_v4 = vsub.f32 %v5602_v1, %v1165_v61 }
  0xd9   :  { %4556 = vmatprep.subr.bf16.mxu0 %v4555_v33  ;;  %v5555_v63 = vsub.f32 %v5538_v25, %v6489_v37  ;;  %v5560_v38 = vsub.f32 %v5540_v22, %v6488_v39  ;;  %v5584_v39 = vld [vmem:[#allocation7 + $0xc8] sm:$0xff]  ;;  %v5586_v37 = vld [vmem:[#allocation7 + $0xe0] sm:$0xff] }
  0xda   :  { %v5536_v8 = vsub.f32 %v5524_v35, %v6490_v46  ;;  %v5591_v46 = vsub.f32 %v5562_v40, %v6498_v9  ;;  %6696 = vst [vmem:[#allocation53_spill] sm:$0xff] %v5670_v4 }
  0xdb   :  { %6675 = vst [vmem:[#allocation36_spill] sm:$0xff] %v5555_v63  ;;  %6676 = vst [vmem:[#allocation37_spill] sm:$0xff] %v5560_v38  ;;  %v6492_v6 = vand.u32 4294901760, %v5555_v63  ;;  %v6491_v51 = vand.u32 4294901760, %v5560_v38 }
  0xdc   :  { %4558 = vmatpush3.bf16.msra.mxu0 %v4555_v33  ;;  %6674 = vst [vmem:[#allocation35_spill] sm:$0xff] %v5536_v8  ;;  %v6479_v54 = vand.u32 4294901760, %v5536_v8  ;;  %v2560_v33 = vsub.f32 %v5531_v19, %v6477_v48  ;;  %v5568_v48 = vld [vmem:[#allocation7 + $0xa8] sm:$0xff]  ;;  %6678 = vst [vmem:[#allocation39_spill] sm:$0xff] %v5591_v46 }
  0xdd   :  { %4560 = vmatprep.subr.bf16.mxu0 %v4559_v57  ;;  %v1157_v20 = vand.u32 4294901760, %v5568_v48  ;;  %v2574_v45 = vsub.f32 %v5555_v63, %v6492_v6  ;;  %v5600_v6 = vld [vmem:[#allocation7 + $0xc0] sm:$0xff] }
  0xde   :  { %v2567_v36 = vsub.f32 %v5536_v8, %v6479_v54  ;;  %v2561_v26 = vand.u32 4294901760, %v2560_v33  ;;  %v2581_v33 = vsub.f32 %v5560_v38, %v6491_v51  ;;  %v6514_v51 = vand.u32 4294901760, %v5586_v37 }
  0xdf   :  { %v2575_v5 = vand.u32 4294901760, %v2574_v45  ;;  %v1161_v9 = vand.u32 4294901760, %v5600_v6 }
  0xe0   :  { %4562 = vmatpush3.bf16.msra.mxu0 %v4559_v57  ;;  %v5564_v57 = vld [vmem:[#allocation7 + $0x178] sm:$0xff]  ;;  %v2568_v54 = vand.u32 4294901760, %v2567_v36  ;;  %v5582_v36 = vpack.c.bf16 %v1157_v20, %v1153_v32  ;;  %v2582_v10 = vand.u32 4294901760, %v2581_v33 }
  0xe1   :  { %v6501_v56 = vand.u32 4294901760, %v5564_v57  ;;  %v5615_v45 = vpack.c.bf16 %v1165_v61, %v1161_v9  ;;  %v1093_v33 = vld [vmem:[#allocation7 + $0xf8] sm:$0xff] }
  0xe2   :  { %v4563_v55 = vpack.c.bf16 %v2568_v54, %v2561_v26  ;;  %6677 = vst [vmem:[#allocation38_spill] sm:$0xff] %v5582_v36  ;;  %v6515_v54 = vand.u32 4294901760, %v5584_v39  ;;  %4334 = vmatpush1.bf16.msra.mxu1 %v5582_v36  ;;  %v4567_v50 = vpack.c.bf16 %v2582_v10, %v2575_v5  ;;  %v1096_v36 = vld [vmem:[#allocation7 + $0x110] sm:$0xff]  ;;  %v1167_v11 = vand.u32 4294901760, %v1093_v33 }
  0xe3   :  { %v5596_v26 = vsub.f32 %v5564_v57, %v6501_v56  ;;  %v6519_v56 = vand.u32 4294901760, %v5591_v46  ;;  %6681 = vst [vmem:[#allocation42_spill] sm:$0xff] %v5615_v45  ;;  %v1171_v7 = vand.u32 4294901760, %v1096_v36 }
  0xe4   :  { %4564 = vmatprep.subr.bf16.mxu0 %v4563_v55  ;;  %v5613_v41 = vpack.c.bf16 %v6514_v51, %v6515_v54  ;;  %v1092_v51 = vld [vmem:[#allocation7 + $0xf0] sm:$0xff]  ;;  %v1095_v54 = vld [vmem:[#allocation7 + $0x108] sm:$0xff] }
  0xe5   :  { %6679 = vst [vmem:[#allocation40_spill] sm:$0xff] %v5596_v26  ;;  %4566 = vmatpush3.bf16.msra.mxu0 %v4563_v55  ;;  %v6522_v47 = vand.u32 4294901760, %v5596_v26  ;;  %v2588_v55 = vsub.f32 %v5591_v46, %v6519_v56  ;;  %v1169_v10 = vand.u32 4294901760, %v1092_v51  ;;  %v1173_v5 = vand.u32 4294901760, %v1095_v54 }
  0xe6   :  { %6680 = vst [vmem:[#allocation41_spill] sm:$0xff] %v5613_v41  ;;  %4336 = vmatprep.subr.bf16.mxu1 %v5613_v41  ;;  %4568 = vmatprep.subr.bf16.mxu0 %v4567_v50  ;;  %v5625_v58 = vpack.c.bf16 %v1171_v7, %v1167_v11 }
  0xe7   :  { %v2595_v59 = vsub.f32 %v5596_v26, %v6522_v47  ;;  %4338 = vmatpush1.bf16.msra.mxu1 %v5615_v45  ;;  %v2589_v15 = vand.u32 4294901760, %v2588_v55  ;;  %v5627_v56 = vpack.c.bf16 %v1173_v5, %v1169_v10  ;;  %v1099_v47 = vld [vmem:[#allocation7 + $0x128] sm:$0xff]  ;;  %v1181_v45 = vand.u32 4294901760, %v1101_v17 }
  0xe8   :  { %6682 = vst [vmem:[#allocation43_spill] sm:$0xff] %v5625_v58  ;;  %4340 = vmatprep.subr.bf16.mxu1 %v5625_v58  ;;  %v1175_v41 = vand.u32 4294901760, %v1099_v47  ;;  %v5635_v55 = vpack.c.bf16 %v5407_v0, %v5405_v62  ;;  %v6687_v58 = vand.u32 4294901760, %v5522_v53  ;;  %v1108_v0 = vld [vmem:[#allocation7 + $0x170] sm:$0xff]  ;;  %v6698_v53 = vand.u32 4294901760, %v5540_v22 }
  0xe9   :  { %4570 = vmatpush3.bf16.msra.mxu0 %v4567_v50  ;;  %v2596_v21 = vand.u32 4294901760, %v2595_v59  ;;  %6683 = vst [vmem:[#allocation44_spill] sm:$0xff] %v5627_v56  ;;  %v1177_v50 = vand.u32 4294901760, %v1098_v43 }
  0xea   :  { %v5631_v59 = vpack.c.bf16 %v1179_v29, %v1175_v41  ;;  %6685 = vst [vmem:[#allocation46_spill] sm:$0xff] %v5635_v55  ;;  %v5710_v22 = vsub.f32 %v1099_v47, %v1175_v41 }
  0xeb   :  { %v4571_v18 = vpack.c.bf16 %v2596_v21, %v2589_v15  ;;  %4342 = vmatpush1.bf16.msra.mxu1 %v5627_v56  ;;  %v5638_v21 = vsub.f32 %v5566_v30, %v1153_v32  ;;  %v5641_v15 = vsub.f32 %v5568_v48, %v1157_v20  ;;  %v6688_v56 = vand.u32 4294901760, %v5524_v35  ;;  %v1104_v20 = vld [vmem:[#allocation7 + $0x150] sm:$0xff]  ;;  %v1107_v48 = vld [vmem:[#allocation7 + $0x168] sm:$0xff] }
  0xec   :  { %6684 = vst [vmem:[#allocation45_spill] sm:$0xff] %v5631_v59  ;;  %v5649_v24 = vpack.c.bf16 %v1181_v45, %v1177_v50  ;;  %4344 = vmatprep.subr.bf16.mxu1 %v5631_v59  ;;  %v1187_v30 = vand.u32 4294901760, %v1108_v0  ;;  %v6693_v59 = vand.u32 4294901760, %v5586_v37  ;;  %v6697_v35 = vand.u32 4294901760, %v5538_v25  ;;  %6711 = vst [vmem:[#allocation62_spill] sm:$0xff] %v5710_v22 }
  0xed   :  { %4572 = vmatprep.subr.bf16.mxu0 %v4571_v18  ;;  %6686 = vst [vmem:[#allocation47_spill] sm:$0xff] %v5641_v15  ;;  %v5647_v16 = vpack.c.bf16 %v6688_v56, %v6687_v58  ;;  %v6691_v58 = vand.u32 4294901760, %v5584_v39 }
  0xee   :  { %4574 = vmatpush3.bf16.msra.mxu0 %v4571_v18  ;;  %6690 = vst [vmem:[#allocation49_spill] sm:$0xff] %v5649_v24  ;;  %v1105_v18 = vld [vmem:[#allocation7 + $0x158] sm:$0xff]  ;;  %v5664_v62 = vsub.f32 %v5586_v37, %v6693_v59  ;;  %v5676_v26 = vpack.c.bf16 %v6698_v53, %v6697_v35  ;;  %v5682_v37 = vsub.f32 %v1096_v36, %v1171_v7  ;;  %v6557_v7 = vmov 0.0  }
  0xef   :  { %6689 = vst [vmem:[#allocation48_spill] sm:$0xff] %v5647_v16  ;;  %4576 = vmatprep.subr.bf16.mxu0 %v5635_v55  ;;  %4346 = vmatpush1.bf16.msra.mxu1 %v5649_v24  ;;  %v1183_v32 = vand.u32 4294901760, %v1105_v18  ;;  %v5659_v56 = vsub.f32 %v5584_v39, %v6691_v58  ;;  %v1185_v16 = vand.u32 4294901760, %v1104_v20  ;;  %v1189_v24 = vand.u32 4294901760, %v1107_v48 }
  0xf0   :  { %6694 = vst [vmem:[#allocation51_spill] sm:$0xff] %v5664_v62  ;;  %v5667_v55 = vsub.f32 %v5600_v6, %v1161_v9  ;;  %6699 = vst [vmem:[#allocation54_spill] sm:$0xff] %v5676_v26  ;;  %v5680_v58 = vsub.f32 %v1093_v33, %v1167_v11  ;;  %v6704_v9 = vand.u32 4294901760, %v5421_v3  ;;  %v6705_v6 = vand.u32 4294901760, %v5423_v12  ;;  %1223 = vmatprep.mubr.f32.mxu1 %v6557_v7 }
  0xf1   :  { %6692 = vst [vmem:[#allocation50_spill] sm:$0xff] %v5659_v56  ;;  %v5678_v39 = vpack.c.bf16 %v1187_v30, %v1183_v32  ;;  %6702 = vst [vmem:[#allocation57_spill] sm:$0xff] %v5682_v37  ;;  %v5684_v59 = vpack.c.bf16 %v1189_v24, %v1185_v16  ;;  %v6561_v33 = vand.u32 4294901760, %v5466_v52  ;;  %v5700_v53 = vsub.f32 %v1092_v51, %v1169_v10 }
  0xf2   :  { %6695 = vst [vmem:[#allocation52_spill] sm:$0xff] %v5667_v55  ;;  %6701 = vst [vmem:[#allocation56_spill] sm:$0xff] %v5680_v58  ;;  %v1315_v61 = vsub.f32 %v5421_v3, %v6704_v9  ;;  %v1327_v1 = vsub.f32 %v5423_v12, %v6705_v6  ;;  %v5702_v35 = vsub.f32 %v1095_v54, %v1173_v5  ;;  %v6708_v9 = vand.u32 4294901760, %v5562_v40 }
  0xf3   :  { %6700 = vst [vmem:[#allocation55_spill] sm:$0xff] %v5678_v39  ;;  %6703 = vst [vmem:[#allocation58_spill] sm:$0xff] %v5684_v59  ;;  %4348 = vmatprep.subr.bf16.mxu1 %v5678_v39  ;;  %v6709_v6 = vand.u32 4294901760, %v5564_v57  ;;  %v6713_v51 = vand.u32 4294901760, %v5438_v34  ;;  %v6714_v10 = vand.u32 4294901760, %v5442_v27  ;;  %v6715_v57 = vand.u32 4294901760, %v5455_v42 }
  0xf4   :  { %4350 = vmatpush1.bf16.msra.mxu1 %v5684_v59  ;;  %6706 = vst [vmem:[#allocation59_spill] sm:$0xff] %v5700_v53  ;;  %6707 = vst [vmem:[#allocation60_spill] sm:$0xff] %v5702_v35  ;;  %v5712_v59 = vsub.f32 %v1102_v31, %v1179_v29  ;;  %v1316_v36 = vand.u32 4294901760, %v1315_v61  ;;  %v1328_v11 = vand.u32 4294901760, %v1327_v1  ;;  %v6716_v29 = vand.u32 4294901760, %v5457_v14 }
  0xf5   :  { %v5708_v25 = vpack.c.bf16 %v6709_v6, %v6708_v9  ;;  %v1321_v54 = vsub.f32 %v5438_v34, %v6713_v51  ;;  %v1333_v40 = vsub.f32 %v5442_v27, %v6714_v10  ;;  %v1339_v41 = vsub.f32 %v5455_v42, %v6715_v57 }
  0xf6   :  { %6712 = vst [vmem:[#allocation63_spill] sm:$0xff] %v5712_v59  ;;  %v4351_v47 = vpack.c.bf16 %v1328_v11, %v1316_v36  ;;  %v1351_v31 = vsub.f32 %v5457_v14, %v6716_v29  ;;  %v6717_v5 = vand.u32 4294901760, %v5464_v49  ;;  %v1357_v1 = vsub.f32 %v5466_v52, %v6561_v33 }
  0xf7   :  { %6710 = vst [vmem:[#allocation61_spill] sm:$0xff] %v5708_v25  ;;  %v5733_v9 = vsub.f32 %v1098_v43, %v1177_v50  ;;  %v5735_v6 = vsub.f32 %v1101_v17, %v1181_v45  ;;  %v1322_v51 = vand.u32 4294901760, %v1321_v54  ;;  %v1334_v10 = vand.u32 4294901760, %v1333_v40 }
  0xf8   :  { %v1345_v61 = vsub.f32 %v5464_v49, %v6717_v5  ;;  %v5737_v57 = vsub.f32 %v1105_v18, %v1183_v32  ;;  %v5739_v11 = vsub.f32 %v1108_v0, %v1187_v30  ;;  %v5741_v36 = vsub.f32 %v1104_v20, %v1185_v16  ;;  %4352 = vmatprep.subr.bf16.mxu1 %v4351_v47 }
  0xf9   :  { %6718 = vst [vmem:[#allocation64_spill] sm:$0xff] %v5733_v9  ;;  %6719 = vst [vmem:[#allocation65_spill] sm:$0xff] %v5735_v6  ;;  %v5743_v29 = vsub.f32 %v1107_v48, %v1189_v24  ;;  %v5745_v5 = vpack.c.bf16 %v1334_v10, %v1322_v51  ;;  %v1340_v7 = vand.u32 4294901760, %v1339_v41  ;;  %v1352_v39 = vand.u32 4294901760, %v1351_v31 }
  0xfa   :  { %6720 = vst [vmem:[#allocation66_spill] sm:$0xff] %v5737_v57  ;;  %6721 = vst [vmem:[#allocation67_spill] sm:$0xff] %v5739_v11  ;;  %v1346_v33 = vand.u32 4294901760, %v1345_v61  ;;  %v1358_v43 = vand.u32 4294901760, %v1357_v1  ;;  %v6571_v17 = vand.u32 4294901760, %v5481_v44  ;;  %v6570_v45 = vand.u32 4294901760, %v5483_v2 }
  0xfb   :  { %6722 = vst [vmem:[#allocation68_spill] sm:$0xff] %v5741_v36  ;;  %6723 = vst [vmem:[#allocation69_spill] sm:$0xff] %v5743_v29  ;;  %v5749_v50 = vpack.c.bf16 %v1352_v39, %v1340_v7  ;;  %v6568_v0 = vand.u32 4294901760, %v5489_v23  ;;  %v6567_v16 = vand.u32 4294901760, %v5492_v60  ;;  %v6563_v30 = vand.u32 4294901760, %v5507_v28 }
  0xfc   :  { %v5753_v18 = vpack.c.bf16 %v1358_v43, %v1346_v33  ;;  %v1363_v24 = vsub.f32 %v5481_v44, %v6571_v17  ;;  %v1375_v32 = vsub.f32 %v5483_v2, %v6570_v45  ;;  %v6562_v39 = vand.u32 4294901760, %v5511_v13 }
  0xfd   :  { %v1369_v20 = vsub.f32 %v5489_v23, %v6568_v0  ;;  %v1381_v48 = vsub.f32 %v5492_v60, %v6567_v16  ;;  %v6564_v7 = vand.u32 4294901760, %v5638_v21  ;;  %v1387_v40 = vsub.f32 %v5507_v28, %v6563_v30 }
  0xfe   :  { %v1364_v33 = vand.u32 4294901760, %v1363_v24  ;;  %v1376_v54 = vand.u32 4294901760, %v1375_v32  ;;  %v6565_v41 = vand.u32 4294901760, %v5641_v15  ;;  %v1399_v61 = vsub.f32 %v5511_v13, %v6562_v39 }
  0xff   :  { %v1370_v47 = vand.u32 4294901760, %v1369_v20  ;;  %v1382_v31 = vand.u32 4294901760, %v1381_v48  ;;  %v1393_v1 = vsub.f32 %v5638_v21, %v6564_v7  ;;  %v1388_v10 = vand.u32 4294901760, %v1387_v40 }
 0x100   :  { %v5780_v51 = vpack.c.bf16 %v1376_v54, %v1364_v33  ;;  %v1405_v43 = vsub.f32 %v5641_v15, %v6565_v41  ;;  %v5787_v24 = vpack.c.bf16 %v5536_v8, %v5531_v19  ;;  %v1400_v20 = vand.u32 4294901760, %v1399_v61 }
 0x101   :  { %v5789_v32 = vpack.c.bf16 %v1382_v31, %v1370_v47  ;;  %v1394_v48 = vand.u32 4294901760, %v1393_v1  ;;  %v6566_v39 = vand.u32 4294901760, %v5659_v56  ;;  %v6569_v7 = vand.u32 4294901760, %v5664_v62 }
 0x102   :  { %v1406_v30 = vand.u32 4294901760, %v1405_v43  ;;  %v6572_v33 = vand.u32 4294901760, %v5667_v55  ;;  %v6574_v54 = vand.u32 4294901760, %v5670_v4  ;;  %v5795_v40 = vpack.c.bf16 %v1400_v20, %v1388_v10 }
 0x103   :  { %v1411_v41 = vsub.f32 %v5659_v56, %v6566_v39  ;;  %v5802_v47 = vpack.c.bf16 %v5560_v38, %v5555_v63  ;;  %v6573_v31 = vand.u32 4294901760, %v5680_v58  ;;  %v1423_v1 = vsub.f32 %v5664_v62, %v6569_v7 }
 0x104   :  { %v5805_v61 = vpack.c.bf16 %v1406_v30, %v1394_v48  ;;  %v1417_v10 = vsub.f32 %v5667_v55, %v6572_v33  ;;  %v1429_v43 = vsub.f32 %v5670_v4, %v6574_v54  ;;  %v6576_v30 = vand.u32 4294901760, %v5682_v37 }
 0x105   :  { %v1412_v20 = vand.u32 4294901760, %v1411_v41  ;;  %v1435_v39 = vsub.f32 %v5680_v58, %v6573_v31  ;;  %v6578_v48 = vand.u32 4294901760, %v5700_v53  ;;  %v1424_v16 = vand.u32 4294901760, %v1423_v1  ;;  %v6724_v31 = vld [vmem:[#allocation40_spill] sm:$0xff] }
 0x106   :  { %v1418_v0 = vand.u32 4294901760, %v1417_v10  ;;  %v1430_v7 = vand.u32 4294901760, %v1429_v43  ;;  %v6580_v45 = vand.u32 4294901760, %v5702_v35  ;;  %v1447_v33 = vsub.f32 %v5682_v37, %v6576_v30 }
 0x107   :  { %v1436_v17 = vand.u32 4294901760, %v1435_v39  ;;  %v1441_v41 = vsub.f32 %v5700_v53, %v6578_v48  ;;  %v5830_v54 = vpack.c.bf16 %v6724_v31, %v5591_v46  ;;  %v5832_v38 = vpack.c.bf16 %v1424_v16, %v1412_v20 }
 0x108   :  { %v5834_v1 = vpack.c.bf16 %v1430_v7, %v1418_v0  ;;  %v1453_v39 = vsub.f32 %v5702_v35, %v6580_v45  ;;  %v6581_v10 = vand.u32 4294901760, %v5710_v22  ;;  %v1448_v43 = vand.u32 4294901760, %v1447_v33 }
 0x109   :  { %v1442_v30 = vand.u32 4294901760, %v1441_v41  ;;  %v6583_v63 = vand.u32 4294901760, %v5712_v59  ;;  %v6584_v48 = vand.u32 4294901760, %v5733_v9  ;;  %v6587_v0 = vand.u32 4294901760, %v5735_v6 }
 0x10a   :  { %v1454_v8 = vand.u32 4294901760, %v1453_v39  ;;  %v1459_v16 = vsub.f32 %v5710_v22, %v6581_v10  ;;  %v6588_v7 = vand.u32 4294901760, %v5737_v57  ;;  %v5847_v20 = vpack.c.bf16 %v1448_v43, %v1436_v17 }
 0x10b   :  { %v1471_v33 = vsub.f32 %v5712_v59, %v6583_v63  ;;  %v1465_v41 = vsub.f32 %v5733_v9, %v6584_v48  ;;  %v6589_v39 = vand.u32 4294901760, %v5739_v11  ;;  %v1477_v10 = vsub.f32 %v5735_v6, %v6587_v0 }
 0x10c   :  { %v5856_v45 = vpack.c.bf16 %v1454_v8, %v1442_v30  ;;  %v1460_v31 = vand.u32 4294901760, %v1459_v16  ;;  %v1483_v17 = vsub.f32 %v5737_v57, %v6588_v7  ;;  %v6591_v48 = vand.u32 4294901760, %v5741_v36 }
 0x10d   :  { %v1472_v43 = vand.u32 4294901760, %v1471_v33  ;;  %v1466_v46 = vand.u32 4294901760, %v1465_v41  ;;  %v1495_v63 = vsub.f32 %v5739_v11, %v6589_v39  ;;  %v1478_v19 = vand.u32 4294901760, %v1477_v10 }
 0x10e   :  { %v1484_v8 = vand.u32 4294901760, %v1483_v17  ;;  %v6590_v30 = vand.u32 4294901760, %v5743_v29  ;;  %v1489_v0 = vsub.f32 %v5741_v36, %v6591_v48 }
 0x10f   :  { %v5869_v16 = vpack.c.bf16 %v1472_v43, %v1460_v31  ;;  %v1496_v25 = vand.u32 4294901760, %v1495_v63  ;;  %v5874_v7 = vpack.c.bf16 %v1478_v19, %v1466_v46 }
 0x110   :  { %v1501_v33 = vsub.f32 %v5743_v29, %v6590_v30  ;;  %v1490_v39 = vand.u32 4294901760, %v1489_v0  ;;  %v3309_v0 = vld [vmem:[%s6458_s2] ss:$0 sm:$0xff] }
 0x111   :  { %v5879_v41 = vpack.c.bf16 %v1496_v25, %v1484_v8 }
 0x112   :  { %v1502_v10 = vand.u32 4294901760, %v1501_v33  ;;  %v3310_v33 = vld [vmem:[%s6458_s2 + $0x1] ss:$0 sm:$0xff] }
 0x114   :  { %v5883_v31 = vpack.c.bf16 %v1502_v10, %v1490_v39 }
 0x14f   :  { %v3677_v43 = vpop.f32.mrb[0].mxu1 }
 0x150   :  { %v394_v8 = vpop.f32.mrb[1].mxu1 }
 0x153   :  { %v3680_v10 = vpop.f32.mrb[2].mxu1 }
 0x154   :  { %v406_v48 = vpop.f32.mrb[3].mxu1 }
 0x157   :  { %v3683_v25 = vpop.f32.mrb[4].mxu1 }
 0x158   :  { %v418_v46 = vpop.f32.mrb[5].mxu1 }
 0x15b   :  { %v3686_v63 = vpop.f32.mrb[6].mxu1 }
 0x15c   :  { %v430_v17 = vpop.f32.mrb[7].mxu1 }
 0x191   :  { %v3853_v55 = vpop.f32.mrb[0].mxu0 }
 0x192   :  { %v4703_v39 = vadd.f32 %v3853_v55, %v3677_v43  ;;  %v982_v53 = vpop.f32.mrb[1].mxu0 }
 0x193   :  { %v4704_v22 = vadd.f32 %v982_v53, %v394_v8  ;;  %v6727_v8 = vld [vmem:[#allocation46_spill] sm:$0xff] }
 0x194   :  { %v1034_v59 = vmul.f32 %v4703_v39, %v3309_v0 }
 0x195   :  { %v1033_v30 = vmul.f32 %v4704_v22, %v3309_v0  ;;  %v3856_v9 = vpop.f32.mrb[2].mxu0 }
 0x196   :  { %v1047_v6 = vadd.f32 %v3310_v33, %v1034_v59  ;;  %v4705_v26 = vadd.f32 %v3856_v9, %v3680_v10  ;;  %v994_v57 = vpop.f32.mrb[3].mxu0 }
 0x197   :  { %v1046_v11 = vadd.f32 %v3310_v33, %v1033_v30  ;;  %v4706_v19 = vadd.f32 %v994_v57, %v406_v48  ;;  %v6725_v57 = vld [vmem:[#allocation15_spill] sm:$0xff] }
 0x198   :  { %v1055_v36 = vmax.f32 %v1047_v6, 0.0  ;;  %v1036_v29 = vmul.f32 %v4705_v26, %v3309_v0  ;;  %v6726_v6 = vld [vmem:[#allocation17_spill] sm:$0xff] }
 0x199   :  { %v1054_v35 = vmax.f32 %v1046_v11, 0.0  ;;  %v1035_v58 = vmul.f32 %v4706_v19, %v3309_v0  ;;  %v3859_v37 = vpop.f32.mrb[4].mxu0  ;;  %v4579_v26 = vpack.c.bf16 %v6726_v6, %v6725_v57 }
 0x19a   :  { %v5921_v55 = vand.u32 4294901760, %v1055_v36  ;;  %v1049_v43 = vadd.f32 %v3310_v33, %v1036_v29  ;;  %v4707_v4 = vadd.f32 %v3859_v37, %v3683_v25  ;;  %v1006_v56 = vpop.f32.mrb[5].mxu0 }
 0x19b   :  { %v5923_v62 = vand.u32 4294901760, %v1054_v35  ;;  %v1048_v53 = vadd.f32 %v3310_v33, %v1035_v58  ;;  %v4708_v22 = vadd.f32 %v1006_v56, %v418_v46 }
 0x19c   :  { %v5926_v59 = vsub.f32 %v1055_v36, %v5921_v55  ;;  %v1057_v9 = vmax.f32 %v1049_v43, 0.0  ;;  %v1038_v30 = vmul.f32 %v4707_v4, %v3309_v0 }
 0x19d   :  { %v5931_v11 = vsub.f32 %v1054_v35, %v5923_v62  ;;  %v1056_v48 = vmax.f32 %v1048_v53, 0.0  ;;  %v1037_v19 = vmul.f32 %v4708_v22, %v3309_v0  ;;  %v3862_v29 = vpop.f32.mrb[6].mxu0  ;;  %3939 = vmatprep.mubr.f32.mxu0 %v5923_v62  ;;  %v6728_v53 = vld [vmem:[#allocation21_spill] sm:$0xff] }
 0x19e   :  { %v5934_v37 = vand.u32 4294901760, %v1057_v9  ;;  %v1051_v58 = vadd.f32 %v3310_v33, %v1038_v30  ;;  %v4709_v56 = vadd.f32 %v3862_v29, %v3686_v63  ;;  %v1018_v46 = vpop.f32.mrb[7].mxu0  ;;  %3940 = vmatmul.mubr.f32.vlgmr.msra.gmra.mrb[8].mxu0 %v5921_v55  ;;  %v5938_v4 = vand.u32 4294901760, %v5926_v59  ;;  %v6729_v63 = vld [vmem:[#allocation22_spill] sm:$0xff] }
 0x19f   :  { %v5941_v36 = vand.u32 4294901760, %v5931_v11  ;;  %v5943_v35 = vand.u32 4294901760, %v1056_v48  ;;  %v1050_v25 = vadd.f32 %v3310_v33, %v1037_v19  ;;  %v4710_v39 = vadd.f32 %v1018_v46, %v430_v17  ;;  %4578 = vmatpush3.bf16.msra.mxu0 %v6727_v8  ;;  %v6732_v8 = vld [vmem:[#allocation27_spill] sm:$0xff] }
 0x1a0   :  { %v1059_v10 = vmax.f32 %v1051_v58, 0.0  ;;  %v1040_v43 = vmul.f32 %v4709_v56, %v3309_v0  ;;  %4580 = vmatprep.subr.bf16.mxu0 %v4579_v26  ;;  %v4583_v22 = vpack.c.bf16 %v6729_v63, %v6728_v53  ;;  %v5955_v17 = vsub.f32 %v1057_v9, %v5934_v37  ;;  %v6731_v9 = vld [vmem:[#allocation26_spill] sm:$0xff] }
 0x1a1   :  { %v5949_v30 = vsub.f32 %v1056_v48, %v5943_v35  ;;  %v1058_v29 = vmax.f32 %v1050_v25, 0.0  ;;  %v1039_v6 = vmul.f32 %v4710_v39, %v3309_v0  ;;  %3942 = vmatprep.mubr.f32.mxu0 %v5943_v35  ;;  %v1227_v57 = vsub.f32 %v5931_v11, %v5941_v36 }
 0x1a2   :  { %v1053_v19 = vadd.f32 %v3310_v33, %v1040_v43  ;;  %3943 = vmatmul.mubr.f32.gmra.mrb[10].mxu0 %v5934_v37  ;;  %v1238_v58 = vsub.f32 %v5926_v59, %v5938_v4  ;;  %v5967_v25 = vand.u32 4294901760, %v1059_v10  ;;  %v4587_v43 = vpack.c.bf16 %v6732_v8, %v6731_v9 }
 0x1a3   :  { %v5960_v56 = vand.u32 4294901760, %v1058_v29  ;;  %v1052_v48 = vadd.f32 %v3310_v33, %v1039_v6  ;;  %4582 = vmatpush3.bf16.msra.mxu0 %v4579_v26  ;;  %v5962_v46 = vand.u32 4294901760, %v1227_v57  ;;  %v5965_v0 = vand.u32 4294901760, %v5949_v30 }
 0x1a4   :  { %v1061_v39 = vmax.f32 %v1053_v19, 0.0  ;;  %4584 = vmatprep.subr.bf16.mxu0 %v4583_v22  ;;  %v5975_v33 = vand.u32 4294901760, %v1238_v58  ;;  %v6734_v26 = vmov 0.0   ;;  %v5998_v58 = vsub.f32 %v1059_v10, %v5967_v25 }
 0x1a5   :  { %6730 = vst [vmem:[#allocation46_spill] sm:$0xff] %v5962_v46  ;;  %v1060_v63 = vmax.f32 %v1052_v48, 0.0  ;;  %1229 = vmatmul.mubr.f32.vlgmr.msra.gmra.mrb[8].mxu1 %v5962_v46  ;;  %3945 = vmatprep.mubr.f32.mxu0 %v5960_v56  ;;  %v5978_v57 = vsub.f32 %v1058_v29, %v5960_v56  ;;  %v1249_v19 = vsub.f32 %v5949_v30, %v5965_v0  ;;  %v5986_v48 = vand.u32 4294901760, %v5955_v17  ;;  %v6736_v29 = vld [vmem:[#allocation32_spill] sm:$0xff] }
 0x1a6   :  { %4354 = vmatpush1.bf16.msra.mxu1 %v5745_v5  ;;  %3946 = vmatmul.mubr.f32.gmra.mrb[12].mxu0 %v5967_v25  ;;  %6733 = vst [vmem:[#allocation21_spill] sm:$0xff] %v5975_v33  ;;  %v5988_v46 = vand.u32 4294901760, %v1061_v39  ;;  %v6735_v5 = vld [vmem:[#allocation31_spill] sm:$0xff] }
 0x1a7   :  { %v5980_v6 = vand.u32 4294901760, %v1060_v63  ;;  %4586 = vmatpush3.bf16.msra.mxu0 %v4583_v22  ;;  %1234 = vmatprep.mubr.f32.mxu1 %v6734_v26  ;;  %v4591_v22 = vpack.c.bf16 %v6736_v29, %v6735_v5  ;;  %v6001_v8 = vand.u32 4294901760, %v1249_v19 }
 0x1a8   :  { %4356 = vmatprep.subr.bf16.mxu1 %v5749_v50  ;;  %4588 = vmatprep.subr.bf16.mxu0 %v4587_v43  ;;  %v1260_v50 = vsub.f32 %v5955_v17, %v5986_v48 }
 0x1a9   :  { %1240 = vmatmul.mubr.f32.gmra.mrb[10].mxu1 %v5975_v33  ;;  %3948 = vmatprep.mubr.f32.mxu0 %v5980_v6  ;;  %6737 = vst [vmem:[#allocation26_spill] sm:$0xff] %v6001_v8  ;;  %v6006_v33 = vand.u32 4294901760, %v5978_v57 }
 0x1aa   :  { %4358 = vmatpush1.bf16.msra.mxu1 %v5753_v18  ;;  %3949 = vmatmul.mubr.f32.gmra.mrb[14].mxu0 %v5988_v46  ;;  %v6014_v18 = vsub.f32 %v1060_v63, %v5980_v6  ;;  %v6017_v10 = vand.u32 4294901760, %v1260_v50  ;;  %v6751_v50 = vpack.c.bf16 %v5483_v2, %v5481_v44 }
 0x1ab   :  { %4590 = vmatpush3.bf16.msra.mxu0 %v4587_v43  ;;  %3983 = vmatprep.mubr.f32.mxu0 %v5931_v11  ;;  %v1271_v43 = vsub.f32 %v5978_v57, %v6006_v33 }
 0x1ac   :  { %1245 = vmatprep.mubr.f32.mxu1 %v6734_v26  ;;  %4360 = vmatprep.subr.bf16.mxu1 %v5780_v51  ;;  %6738 = vst [vmem:[#allocation31_spill] sm:$0xff] %v6017_v10  ;;  %v6022_v51 = vand.u32 4294901760, %v5998_v58  ;;  %v6038_v19 = vand.u32 4294901760, %v6014_v18 }
 0x1ad   :  { %1251 = vmatmul.mubr.f32.gmra.mrb[12].mxu1 %v6001_v8  ;;  %4592 = vmatprep.subr.bf16.mxu0 %v4591_v22  ;;  %v6770_v8 = vld [vmem:[#allocation14_spill] sm:$0xff] }
 0x1ae   :  { %4362 = vmatpush1.bf16.msra.mxu1 %v5789_v32  ;;  %1256 = vmatprep.mubr.f32.mxu1 %v6734_v26  ;;  %v6029_v32 = vsub.f32 %v1061_v39, %v5988_v46  ;;  %v1282_v63 = vsub.f32 %v5998_v58, %v6022_v51  ;;  %v6749_v39 = vld [vmem:[#allocation25_spill] sm:$0xff] }
 0x1af   :  { %4594 = vmatpush3.bf16.msra.mxu0 %v4591_v22  ;;  %4364 = vmatprep.subr.bf16.mxu1 %v5795_v40  ;;  %v6033_v40 = vand.u32 4294901760, %v1271_v43  ;;  %v6750_v22 = vpack.c.bf16 %v5466_v52, %v5464_v49  ;;  %v6752_v43 = vld [vmem:[#allocation30_spill] sm:$0xff] }
 0x1b0   :  { %4596 = vmatprep.subr.bf16.mxu0 %v5787_v24 }
 0x1b1   :  { %1262 = vmatmul.mubr.f32.gmra.mrb[14].mxu1 %v6017_v10  ;;  %6739 = vst [vmem:[#allocation32_spill] sm:$0xff] %v6033_v40  ;;  %v6768_v10 = vld [vmem:[#allocation13_spill] sm:$0xff] }
 0x1b2   :  { %4366 = vmatpush1.bf16.msra.mxu1 %v5805_v61  ;;  %1267 = vmatprep.mubr.f32.mxu1 %v6734_v26  ;;  %v6051_v61 = vand.u32 4294901760, %v6029_v32 }
 0x1b3   :  { %4598 = vmatpush3.bf16.msra.mxu0 %v5787_v24  ;;  %4368 = vmatprep.subr.bf16.mxu1 %v5832_v38  ;;  %v6046_v38 = vand.u32 4294901760, %v1282_v63  ;;  %v1293_v24 = vsub.f32 %v6014_v18, %v6038_v19  ;;  %v6753_v63 = vpack.c.bf16 %v5492_v60, %v5489_v23 }
 0x1b4   :  { %4600 = vmatprep.subr.bf16.mxu0 %v5802_v47 }
 0x1b5   :  { %1273 = vmatmul.mubr.f32.gmra.mrb[16].mxu1 %v6033_v40  ;;  %6740 = vst [vmem:[#allocation70_spill] sm:$0xff] %v6046_v38  ;;  %v6767_v40 = vld [vmem:[#allocation61_spill] sm:$0xff] }
 0x1b6   :  { %4370 = vmatpush1.bf16.msra.mxu1 %v5834_v1  ;;  %1278 = vmatprep.mubr.f32.mxu1 %v6734_v26  ;;  %v1304_v1 = vsub.f32 %v6029_v32, %v6051_v61 }
 0x1b7   :  { %4602 = vmatpush3.bf16.msra.mxu0 %v5802_v47  ;;  %4372 = vmatprep.subr.bf16.mxu1 %v5847_v20  ;;  %v6059_v47 = vand.u32 4294901760, %v1293_v24  ;;  %v6742_v20 = vld [vmem:[#allocation12_spill] sm:$0xff]  ;;  %v6754_v24 = vpack.c.bf16 %v5511_v13, %v5507_v28 }
 0x1b8   :  { %4604 = vmatprep.subr.bf16.mxu0 %v5830_v54 }
 0x1b9   :  { %1284 = vmatmul.mubr.f32.gmra.mrb[18].mxu1 %v6046_v38  ;;  %6741 = vst [vmem:[#allocation71_spill] sm:$0xff] %v6059_v47 }
 0x1ba   :  { %4374 = vmatpush1.bf16.msra.mxu1 %v5856_v45  ;;  %1289 = vmatprep.mubr.f32.mxu1 %v6734_v26  ;;  %v6069_v45 = vand.u32 4294901760, %v1304_v1  ;;  %v6755_v1 = vld [vmem:[#allocation48_spill] sm:$0xff] }
 0x1bb   :  { %4606 = vmatpush3.bf16.msra.mxu0 %v5830_v54  ;;  %4376 = vmatprep.subr.bf16.mxu1 %v5869_v16  ;;  %v6744_v54 = vld [vmem:[#allocation16_spill] sm:$0xff] }
 0x1bc   :  { %4608 = vmatprep.subr.bf16.mxu0 %v6742_v20  ;;  %6743 = vst [vmem:[#allocation12_spill] sm:$0xff] %v6069_v45  ;;  %v6746_v16 = vld [vmem:[#allocation20_spill] sm:$0xff] }
 0x1bd   :  { %1295 = vmatmul.mubr.f32.gmra.mrb[20].mxu1 %v6059_v47  ;;  %v6765_v47 = vld [vmem:[#allocation56_spill] sm:$0xff] }
 0x1be   :  { %4378 = vmatpush1.bf16.msra.mxu1 %v5874_v7  ;;  %3984 = vmatmul.mubr.f32.vlgmr.msra.gmra.mrb[8].mxu0 %v5926_v59  ;;  %v6745_v7 = vpack.c.bf16 %v5423_v12, %v5421_v3 }
 0x1bf   :  { %3986 = vmatprep.mubr.f32.mxu0 %v5949_v30  ;;  %4610 = vmatpush3.bf16.msra.mxu0 %v6742_v20 }
 0x1c0   :  { %1300 = vmatprep.mubr.f32.mxu1 %v6734_v26  ;;  %4380 = vmatprep.subr.bf16.mxu1 %v5879_v41  ;;  %v6747_v41 = vpack.c.bf16 %v5442_v27, %v5438_v34 }
 0x1c1   :  { %1306 = vmatmul.mubr.f32.gmra.mrb[22].mxu1 %v6069_v45  ;;  %4612 = vmatprep.subr.bf16.mxu0 %v6744_v54 }
 0x1c2   :  { %4382 = vmatpush1.bf16.msra.mxu1 %v5883_v31  ;;  %3987 = vmatmul.mubr.f32.gmra.mrb[10].mxu0 %v5955_v17  ;;  %v6748_v31 = vpack.c.bf16 %v5457_v14, %v5455_v42 }
 0x1c3   :  { %3989 = vmatprep.mubr.f32.mxu0 %v5978_v57  ;;  %4614 = vmatpush3.bf16.msra.mxu0 %v6744_v54 }
 0x1c4   :  { %1536 = vmatprep.mubr.f32.mxu1 %v6734_v26  ;;  %4384 = vmatprep.subr.bf16.mxu1 %v6745_v7  ;;  %v6756_v7 = vpack.c.bf16 %v5641_v15, %v5638_v21  ;;  %v6783_v15 = vld [vmem:[#allocation64_spill] sm:$0xff] }
 0x1c5   :  { %1538 = vmatmul.mubr.f32.vlgmr.msra.gmra.mrb[8].mxu1 %v5923_v62  ;;  %4616 = vmatprep.subr.bf16.mxu0 %v6746_v16 }
 0x1c6   :  { %4386 = vmatpush1.bf16.msra.mxu1 %v6747_v41  ;;  %3990 = vmatmul.mubr.f32.gmra.mrb[12].mxu0 %v5998_v58  ;;  %v6757_v41 = vld [vmem:[#allocation51_spill] sm:$0xff] }
 0x1c7   :  { %3992 = vmatprep.mubr.f32.mxu0 %v6014_v18  ;;  %4618 = vmatpush3.bf16.msra.mxu0 %v6746_v16 }
 0x1c8   :  { %1543 = vmatprep.mubr.f32.mxu1 %v6734_v26  ;;  %4388 = vmatprep.subr.bf16.mxu1 %v6748_v31  ;;  %v6758_v31 = vld [vmem:[#allocation50_spill] sm:$0xff] }
 0x1c9   :  { %1545 = vmatmul.mubr.f32.gmra.mrb[10].mxu1 %v5921_v55  ;;  %4620 = vmatprep.subr.bf16.mxu0 %v6749_v39 }
 0x1ca   :  { %4390 = vmatpush1.bf16.msra.mxu1 %v6750_v22  ;;  %3993 = vmatmul.mubr.f32.gmra.mrb[14].mxu0 %v6029_v32  ;;  %v6759_v22 = vpack.c.bf16 %v6757_v41, %v6758_v31  ;;  %v6772_v31 = vld [vmem:[#allocation60_spill] sm:$0xff] }
 0x1cb   :  { %4622 = vmatpush3.bf16.msra.mxu0 %v6749_v39  ;;  %4027 = vmatprep.mubr.f32.mxu0 %v5941_v36 }
 0x1cc   :  { %1550 = vmatprep.mubr.f32.mxu1 %v6734_v26  ;;  %4392 = vmatprep.subr.bf16.mxu1 %v6751_v50  ;;  %v6760_v50 = vld [vmem:[#allocation54_spill] sm:$0xff] }
 0x1cd   :  { %1552 = vmatmul.mubr.f32.gmra.mrb[12].mxu1 %v5943_v35  ;;  %4624 = vmatprep.subr.bf16.mxu0 %v6752_v43 }
 0x1ce   :  { %4394 = vmatpush1.bf16.msra.mxu1 %v6753_v63  ;;  %1557 = vmatprep.mubr.f32.mxu1 %v6734_v26  ;;  %v6761_v63 = vld [vmem:[#allocation53_spill] sm:$0xff] }
 0x1cf   :  { %4626 = vmatpush3.bf16.msra.mxu0 %v6752_v43  ;;  %4396 = vmatprep.subr.bf16.mxu1 %v6754_v24  ;;  %v6762_v24 = vld [vmem:[#allocation52_spill] sm:$0xff] }
 0x1d0   :  { %4628 = vmatprep.subr.bf16.mxu0 %v6755_v1  ;;  %v6763_v45 = vpack.c.bf16 %v6761_v63, %v6762_v24  ;;  %v6773_v63 = vld [vmem:[#allocation59_spill] sm:$0xff]  ;;  %v6782_v24 = vld [vmem:[#allocation65_spill] sm:$0xff] }
 0x1d1   :  { %1559 = vmatmul.mubr.f32.gmra.mrb[14].mxu1 %v5934_v37 }
 0x1d2   :  { %4398 = vmatpush1.bf16.msra.mxu1 %v6756_v7  ;;  %1564 = vmatprep.mubr.f32.mxu1 %v6734_v26  ;;  %v6764_v7 = vld [vmem:[#allocation57_spill] sm:$0xff] }
 0x1d3   :  { %4630 = vmatpush3.bf16.msra.mxu0 %v6755_v1  ;;  %4400 = vmatprep.subr.bf16.mxu1 %v6759_v22  ;;  %v6766_v38 = vpack.c.bf16 %v6764_v7, %v6765_v47  ;;  %v6769_v22 = vand.u32 4294901760, %v6768_v10  ;;  %v6771_v1 = vand.u32 4294901760, %v6770_v8  ;;  %v6776_v7 = vld [vmem:[#allocation62_spill] sm:$0xff]  ;;  %v6778_v10 = vld [vmem:[#allocation15_spill] sm:$0xff] }
 0x1d4   :  { %4632 = vmatprep.subr.bf16.mxu0 %v6760_v50  ;;  %v6779_v8 = vand.u32 4294901760, %v6778_v10  ;;  %v6788_v10 = vand.u32 4294901760, %v6728_v53  ;;  %v6795_v53 = vand.u32 4294901760, %v6731_v9  ;;  %v6801_v9 = vand.u32 4294901760, %v6736_v29  ;;  %v6809_v29 = vld [vmem:[#allocation33_spill] sm:$0xff] }
 0x1d5   :  { %1566 = vmatmul.mubr.f32.gmra.mrb[16].mxu1 %v5960_v56  ;;  %v4639_v41 = vpack.c.bf16 %v6771_v1, %v6769_v22  ;;  %v6780_v1 = vld [vmem:[#allocation17_spill] sm:$0xff] }
 0x1d6   :  { %4402 = vmatpush1.bf16.msra.mxu1 %v6763_v45  ;;  %1571 = vmatprep.mubr.f32.mxu1 %v6734_v26  ;;  %v6774_v45 = vpack.c.bf16 %v6772_v31, %v6773_v63  ;;  %v6781_v22 = vand.u32 4294901760, %v6780_v1  ;;  %v6784_v31 = vpack.c.bf16 %v6782_v24, %v6783_v15  ;;  %v6792_v24 = vld [vmem:[#allocation68_spill] sm:$0xff] }
 0x1d7   :  { %4634 = vmatpush3.bf16.msra.mxu0 %v6760_v50  ;;  %4404 = vmatprep.subr.bf16.mxu1 %v6766_v38  ;;  %v6775_v50 = vld [vmem:[#allocation63_spill] sm:$0xff] }
 0x1d8   :  { %4636 = vmatprep.subr.bf16.mxu0 %v6767_v40  ;;  %v6777_v38 = vpack.c.bf16 %v6775_v50, %v6776_v7  ;;  %v4643_v47 = vpack.c.bf16 %v6781_v22, %v6779_v8  ;;  %v6789_v8 = vld [vmem:[#allocation22_spill] sm:$0xff] }
 0x1d9   :  { %1573 = vmatmul.mubr.f32.gmra.mrb[18].mxu1 %v5967_v25  ;;  %v6790_v1 = vand.u32 4294901760, %v6789_v8 }
 0x1da   :  { %4406 = vmatpush1.bf16.msra.mxu1 %v6774_v45  ;;  %1578 = vmatprep.mubr.f32.mxu1 %v6734_v26  ;;  %v6785_v45 = vld [vmem:[#allocation67_spill] sm:$0xff] }
 0x1db   :  { %4638 = vmatpush3.bf16.msra.mxu0 %v6767_v40  ;;  %4408 = vmatprep.subr.bf16.mxu1 %v6777_v38  ;;  %v6786_v38 = vld [vmem:[#allocation66_spill] sm:$0xff]  ;;  %v4647_v22 = vpack.c.bf16 %v6790_v1, %v6788_v10  ;;  %v6798_v1 = vld [vmem:[#allocation19_spill] sm:$0xff] }
 0x1dc   :  { %4640 = vmatprep.subr.bf16.mxu0 %v4639_v41  ;;  %v6787_v40 = vpack.c.bf16 %v6785_v45, %v6786_v38 }
 0x1dd   :  { %1580 = vmatmul.mubr.f32.gmra.mrb[20].mxu1 %v5980_v6 }
 0x1de   :  { %4410 = vmatpush1.bf16.msra.mxu1 %v6784_v31  ;;  %4028 = vmatmul.mubr.f32.vlgmr.msra.gmra.mrb[8].mxu0 %v5938_v4  ;;  %v6791_v31 = vld [vmem:[#allocation69_spill] sm:$0xff] }
 0x1df   :  { %4030 = vmatprep.mubr.f32.mxu0 %v5965_v0  ;;  %4642 = vmatpush3.bf16.msra.mxu0 %v4639_v41  ;;  %v6793_v15 = vpack.c.bf16 %v6791_v31, %v6792_v24  ;;  %v6796_v41 = vld [vmem:[#allocation27_spill] sm:$0xff] }
 0x1e0   :  { %1585 = vmatprep.mubr.f32.mxu1 %v6734_v26  ;;  %4412 = vmatprep.subr.bf16.mxu1 %v6787_v40  ;;  %v6794_v40 = vld [vmem:[#allocation18_spill] sm:$0xff]  ;;  %v6797_v10 = vand.u32 4294901760, %v6796_v41 }
 0x1e1   :  { %1587 = vmatmul.mubr.f32.gmra.mrb[22].mxu1 %v5988_v46  ;;  %4644 = vmatprep.subr.bf16.mxu0 %v4643_v47  ;;  %v6804_v41 = vld [vmem:[#allocation34_spill] sm:$0xff] }
 0x1e2   :  { %4414 = vmatpush1.bf16.msra.mxu1 %v6793_v15  ;;  %4031 = vmatmul.mubr.f32.gmra.mrb[10].mxu0 %v5986_v48  ;;  %v4651_v8 = vpack.c.bf16 %v6797_v10, %v6795_v53  ;;  %v6799_v15 = vld [vmem:[#allocation23_spill] sm:$0xff]  ;;  %v6802_v53 = vld [vmem:[#allocation24_spill] sm:$0xff]  ;;  %v6805_v10 = vand.u32 4294901760, %v6804_v41  ;;  %v6814_v41 = vld [vmem:[#allocation38_spill] sm:$0xff] }
 0x1e3   :  { %4033 = vmatprep.mubr.f32.mxu0 %v6006_v33  ;;  %4646 = vmatpush3.bf16.msra.mxu0 %v4643_v47 }
 0x1e4   :  { %1721 = vmatprep.mubr.f32.mxu1 %v6734_v26  ;;  %4416 = vmatprep.subr.bf16.mxu1 %v6794_v40 }
 0x1e5   :  { %1724 = vmatmul.mubr.f32.vlgmr.msra.gmra.mrb[8].mxu1 %v5931_v11  ;;  %4648 = vmatprep.subr.bf16.mxu0 %v4647_v22  ;;  %v6800_v11 = vand.u32 4294901760, %v6735_v5  ;;  %v6808_v5 = vld [vmem:[#allocation29_spill] sm:$0xff] }
 0x1e6   :  { %4418 = vmatpush1.bf16.msra.mxu1 %v6798_v1  ;;  %4034 = vmatmul.mubr.f32.gmra.mrb[12].mxu0 %v6022_v51 }
 0x1e7   :  { %4036 = vmatprep.mubr.f32.mxu0 %v6038_v19  ;;  %4650 = vmatpush3.bf16.msra.mxu0 %v4647_v22  ;;  %v4655_v47 = vpack.c.bf16 %v6801_v9, %v6800_v11  ;;  %v6803_v22 = vld [vmem:[#allocation28_spill] sm:$0xff]  ;;  %v6812_v9 = vld [vmem:[#allocation37_spill] sm:$0xff] }
 0x1e8   :  { %1729 = vmatprep.mubr.f32.mxu1 %v6734_v26  ;;  %4420 = vmatprep.subr.bf16.mxu1 %v6799_v15 }
 0x1e9   :  { %1732 = vmatmul.mubr.f32.gmra.mrb[10].mxu1 %v5926_v59  ;;  %4652 = vmatprep.subr.bf16.mxu0 %v4651_v8  ;;  %v6806_v59 = vld [vmem:[#allocation35_spill] sm:$0xff] }
 0x1ea   :  { %4422 = vmatpush1.bf16.msra.mxu1 %v6802_v53  ;;  %4037 = vmatmul.mubr.f32.gmra.mrb[14].mxu0 %v6051_v61  ;;  %v6807_v15 = vand.u32 4294901760, %v6806_v59 }
 0x1eb   :  { %4654 = vmatpush3.bf16.msra.mxu0 %v4651_v8  ;;  %4071 = vmatprep.mubr.f32.mxu0 %v5923_v62  ;;  %v6810_v8 = vld [vmem:[#allocation36_spill] sm:$0xff] }
 0x1ec   :  { %1737 = vmatprep.mubr.f32.mxu1 %v6734_v26  ;;  %4424 = vmatprep.subr.bf16.mxu1 %v6803_v22  ;;  %v4659_v1 = vpack.c.bf16 %v6807_v15, %v6805_v10  ;;  %v6811_v11 = vand.u32 4294901760, %v6810_v8  ;;  %v6813_v22 = vand.u32 4294901760, %v6812_v9  ;;  %v6816_v15 = vld [vmem:[#allocation39_spill] sm:$0xff]  ;;  %v6818_v10 = vld [vmem:[#allocation40_spill] sm:$0xff]  ;;  %v6820_v8 = vld [vmem:[#allocation42_spill] sm:$0xff]  ;;  %v6829_v9 = vand.u32 4294901760, %v5438_v34 }
 0x1ed   :  { %1740 = vmatmul.mubr.f32.gmra.mrb[12].mxu1 %v5949_v30  ;;  %4656 = vmatprep.subr.bf16.mxu0 %v4655_v47  ;;  %v6815_v30 = vld [vmem:[#allocation41_spill] sm:$0xff]  ;;  %v6819_v59 = vand.u32 4294901760, %v6818_v10  ;;  %v6833_v34 = vand.u32 4294901760, %v5464_v49  ;;  %v6837_v49 = vand.u32 4294901760, %v5489_v23  ;;  %v6841_v23 = vand.u32 4294901760, %v5638_v21 }
 0x1ee   :  { %4426 = vmatpush1.bf16.msra.mxu1 %v6808_v5  ;;  %1745 = vmatprep.mubr.f32.mxu1 %v6734_v26  ;;  %v4663_v53 = vpack.c.bf16 %v6813_v22, %v6811_v11  ;;  %v6823_v22 = vld [vmem:[#allocation45_spill] sm:$0xff] }
 0x1ef   :  { %4658 = vmatpush3.bf16.msra.mxu0 %v4655_v47  ;;  %4428 = vmatprep.subr.bf16.mxu1 %v6809_v29  ;;  %v6817_v47 = vand.u32 4294901760, %v6816_v15  ;;  %v6830_v15 = vand.u32 4294901760, %v5442_v27  ;;  %v6834_v27 = vand.u32 4294901760, %v5466_v52  ;;  %v6838_v52 = vand.u32 4294901760, %v5492_v60  ;;  %v6842_v60 = vld [vmem:[#allocation47_spill] sm:$0xff] }
 0x1f0   :  { %4660 = vmatprep.subr.bf16.mxu0 %v4659_v1 }
 0x1f1   :  { %1748 = vmatmul.mubr.f32.gmra.mrb[14].mxu1 %v5955_v17  ;;  %v4667_v29 = vpack.c.bf16 %v6819_v59, %v6817_v47  ;;  %v6821_v17 = vld [vmem:[#allocation43_spill] sm:$0xff]  ;;  %v4449_v47 = vpack.c.bf16 %v6830_v15, %v6829_v9  ;;  %v4453_v10 = vpack.c.bf16 %v6834_v27, %v6833_v34  ;;  %v4457_v59 = vpack.c.bf16 %v6838_v52, %v6837_v49  ;;  %v6853_v34 = vld [vmem:[#allocation56_spill] sm:$0xff] }
 0x1f2   :  { %4430 = vmatpush1.bf16.msra.mxu1 %v6814_v41  ;;  %1753 = vmatprep.mubr.f32.mxu1 %v6734_v26  ;;  %v6854_v27 = vand.u32 4294901760, %v6853_v34  ;;  %v6859_v49 = vld [vmem:[#allocation60_spill] sm:$0xff] }
 0x1f3   :  { %4662 = vmatpush3.bf16.msra.mxu0 %v4659_v1  ;;  %4432 = vmatprep.subr.bf16.mxu1 %v6815_v30  ;;  %v6822_v1 = vld [vmem:[#allocation44_spill] sm:$0xff]  ;;  %v6860_v52 = vand.u32 4294901760, %v6859_v49 }
 0x1f4   :  { %4664 = vmatprep.subr.bf16.mxu0 %v4663_v53 }
 0x1f5   :  { %1756 = vmatmul.mubr.f32.gmra.mrb[16].mxu1 %v5978_v57  ;;  %v6824_v57 = vld [vmem:[#allocation49_spill] sm:$0xff] }
 0x1f6   :  { %4434 = vmatpush1.bf16.msra.mxu1 %v6820_v8  ;;  %1761 = vmatprep.mubr.f32.mxu1 %v6734_v26 }
 0x1f7   :  { %4666 = vmatpush3.bf16.msra.mxu0 %v4663_v53  ;;  %4436 = vmatprep.subr.bf16.mxu1 %v6821_v17  ;;  %v6826_v53 = vand.u32 4294901760, %v5421_v3  ;;  %v6831_v3 = vand.u32 4294901760, %v5455_v42  ;;  %v6835_v42 = vand.u32 4294901760, %v5481_v44  ;;  %v6839_v44 = vand.u32 4294901760, %v5507_v28  ;;  %v6844_v28 = vld [vmem:[#allocation50_spill] sm:$0xff] }
 0x1f8   :  { %4668 = vmatprep.subr.bf16.mxu0 %v4667_v29 }
 0x1f9   :  { %1764 = vmatmul.mubr.f32.gmra.mrb[18].mxu1 %v5998_v58  ;;  %v6825_v58 = vld [vmem:[#allocation55_spill] sm:$0xff] }
 0x1fa   :  { %4438 = vmatpush1.bf16.msra.mxu1 %v6822_v1  ;;  %1769 = vmatprep.mubr.f32.mxu1 %v6734_v26 }
 0x1fb   :  { %4670 = vmatpush3.bf16.msra.mxu0 %v4667_v29  ;;  %4440 = vmatprep.subr.bf16.mxu1 %v6823_v22  ;;  %v6827_v29 = vand.u32 4294901760, %v5423_v12  ;;  %v6832_v12 = vand.u32 4294901760, %v5457_v14  ;;  %v6836_v14 = vand.u32 4294901760, %v5483_v2  ;;  %v6840_v2 = vand.u32 4294901760, %v5511_v13 }
 0x1fc   :  { %4672 = vmatprep.subr.bf16.mxu0 %v6742_v20  ;;  %v6845_v13 = vand.u32 4294901760, %v6844_v28 }
 0x1fd   :  { %1772 = vmatmul.mubr.f32.gmra.mrb[20].mxu1 %v6014_v18  ;;  %v4447_v11 = vpack.c.bf16 %v6827_v29, %v6826_v53  ;;  %v6828_v18 = vld [vmem:[#allocation58_spill] sm:$0xff]  ;;  %v4459_v53 = vpack.c.bf16 %v6840_v2, %v6839_v44  ;;  %v6861_v44 = vand.u32 4294901760, %v6776_v7  ;;  %v6862_v2 = vand.u32 4294901760, %v6775_v50 }
 0x1fe   :  { %4442 = vmatpush1.bf16.msra.mxu1 %v6824_v57  ;;  %4072 = vmatmul.mubr.f32.vlgmr.msra.gmra.mrb[8].mxu0 %v5921_v55  ;;  %v6868_v7 = vand.u32 4294901760, %v6786_v38  ;;  %v6869_v50 = vand.u32 4294901760, %v6785_v45  ;;  %v6875_v45 = vld [vmem:[#allocation28_spill] sm:$0xff]  ;;  %v6876_v38 = vld [vmem:[#allocation33_spill] sm:$0xff] }
 0x1ff   :  { %4074 = vmatprep.mubr.f32.mxu0 %v5943_v35  ;;  %4674 = vmatpush3.bf16.msra.mxu0 %v6742_v20 }
 0x200   :  { %1777 = vmatprep.mubr.f32.mxu1 %v6734_v26  ;;  %4444 = vmatprep.subr.bf16.mxu1 %v6825_v58  ;;  %v4475_v28 = vpack.c.bf16 %v6869_v50, %v6868_v7 }
 0x201   :  { %1780 = vmatmul.mubr.f32.gmra.mrb[22].mxu1 %v6029_v32  ;;  %4676 = vmatprep.subr.bf16.mxu0 %v6744_v54  ;;  %v4451_v32 = vpack.c.bf16 %v6832_v12, %v6831_v3  ;;  %v6851_v3 = vld [vmem:[#allocation53_spill] sm:$0xff] }
 0x202   :  { %4446 = vmatpush1.bf16.msra.mxu1 %v6828_v18  ;;  %4075 = vmatmul.mubr.f32.gmra.mrb[10].mxu0 %v5934_v37  ;;  %v6852_v12 = vand.u32 4294901760, %v6851_v3 }
 0x203   :  { %4077 = vmatprep.mubr.f32.mxu0 %v5960_v56  ;;  %4678 = vmatpush3.bf16.msra.mxu0 %v6744_v54 }
 0x204   :  { %1882 = vmatprep.mubr.f32.mxu1 %v6734_v26  ;;  %4448 = vmatprep.subr.bf16.mxu1 %v4447_v11  ;;  %v6846_v11 = vld [vmem:[#allocation51_spill] sm:$0xff] }
 0x205   :  { %1886 = vmatmul.mubr.f32.vlgmr.msra.gmra.mrb[8].mxu1 %v5941_v36  ;;  %4680 = vmatprep.subr.bf16.mxu0 %v6746_v16  ;;  %v4455_v36 = vpack.c.bf16 %v6836_v14, %v6835_v42  ;;  %v6847_v9 = vand.u32 4294901760, %v6846_v11 }
 0x206   :  { %4450 = vmatpush1.bf16.msra.mxu1 %v4449_v47  ;;  %4078 = vmatmul.mubr.f32.gmra.mrb[12].mxu0 %v5967_v25  ;;  %v6848_v47 = vld [vmem:[#allocation48_spill] sm:$0xff] }
 0x207   :  { %4080 = vmatprep.mubr.f32.mxu0 %v5980_v6  ;;  %4682 = vmatpush3.bf16.msra.mxu0 %v6746_v16  ;;  %v4463_v15 = vpack.c.bf16 %v6847_v9, %v6845_v13  ;;  %v6871_v13 = vand.u32 4294901760, %v6791_v31 }
 0x208   :  { %1891 = vmatprep.mubr.f32.mxu1 %v6734_v26  ;;  %4452 = vmatprep.subr.bf16.mxu1 %v4451_v32 }
 0x209   :  { %1895 = vmatmul.mubr.f32.gmra.mrb[10].mxu1 %v5938_v4  ;;  %4684 = vmatprep.subr.bf16.mxu0 %v6749_v39  ;;  %v6843_v4 = vand.u32 4294901760, %v6842_v60  ;;  %v6866_v60 = vld [vmem:[#allocation65_spill] sm:$0xff] }
 0x20a   :  { %4454 = vmatpush1.bf16.msra.mxu1 %v4453_v10  ;;  %4081 = vmatmul.mubr.f32.gmra.mrb[14].mxu0 %v5988_v46  ;;  %v6855_v10 = vld [vmem:[#allocation57_spill] sm:$0xff] }
 0x20b   :  { %4686 = vmatpush3.bf16.msra.mxu0 %v6749_v39  ;;  %4115 = vmatprep.mubr.f32.mxu0 %v5923_v62  ;;  %v4461_v29 = vpack.c.bf16 %v6843_v4, %v6841_v23  ;;  %v6856_v42 = vand.u32 4294901760, %v6855_v10  ;;  %v6863_v23 = vld [vmem:[#allocation61_spill] sm:$0xff]  ;;  %v6867_v4 = vand.u32 4294901760, %v6866_v60 }
 0x20c   :  { %1900 = vmatprep.mubr.f32.mxu1 %v6734_v26  ;;  %4456 = vmatprep.subr.bf16.mxu1 %v4455_v36  ;;  %v6857_v36 = vld [vmem:[#allocation54_spill] sm:$0xff] }
 0x20d   :  { %1904 = vmatmul.mubr.f32.gmra.mrb[12].mxu1 %v5965_v0  ;;  %4688 = vmatprep.subr.bf16.mxu0 %v6752_v43  ;;  %v6849_v0 = vld [vmem:[#allocation52_spill] sm:$0xff]  ;;  %v4467_v14 = vpack.c.bf16 %v6856_v42, %v6854_v27 }
 0x20e   :  { %4458 = vmatpush1.bf16.msra.mxu1 %v4457_v59  ;;  %1909 = vmatprep.mubr.f32.mxu1 %v6734_v26  ;;  %v6850_v21 = vand.u32 4294901760, %v6849_v0 }
 0x20f   :  { %4690 = vmatpush3.bf16.msra.mxu0 %v6752_v43  ;;  %4460 = vmatprep.subr.bf16.mxu1 %v4459_v53  ;;  %v4471_v53 = vpack.c.bf16 %v6862_v2, %v6861_v44 }
 0x210   :  { %4692 = vmatprep.subr.bf16.mxu0 %v6848_v47  ;;  %v4465_v32 = vpack.c.bf16 %v6852_v12, %v6850_v21 }
 0x211   :  { %1913 = vmatmul.mubr.f32.gmra.mrb[14].mxu1 %v5986_v48  ;;  %v6858_v48 = vand.u32 4294901760, %v6773_v63 }
 0x212   :  { %4462 = vmatpush1.bf16.msra.mxu1 %v4461_v29  ;;  %1918 = vmatprep.mubr.f32.mxu1 %v6734_v26 }
 0x213   :  { %4694 = vmatpush3.bf16.msra.mxu0 %v6848_v47  ;;  %4464 = vmatprep.subr.bf16.mxu1 %v4463_v15  ;;  %v4469_v59 = vpack.c.bf16 %v6860_v52, %v6858_v48 }
 0x214   :  { %4696 = vmatprep.subr.bf16.mxu0 %v6857_v36 }
 0x215   :  { %1922 = vmatmul.mubr.f32.gmra.mrb[16].mxu1 %v6006_v33  ;;  %v6864_v33 = vld [vmem:[#allocation64_spill] sm:$0xff] }
 0x216   :  { %4466 = vmatpush1.bf16.msra.mxu1 %v4465_v32  ;;  %1927 = vmatprep.mubr.f32.mxu1 %v6734_v26  ;;  %v6865_v63 = vand.u32 4294901760, %v6864_v33 }
 0x217   :  { %4698 = vmatpush3.bf16.msra.mxu0 %v6857_v36  ;;  %4468 = vmatprep.subr.bf16.mxu1 %v4467_v14 }
 0x218   :  { %4700 = vmatprep.subr.bf16.mxu0 %v6863_v23  ;;  %v4473_v29 = vpack.c.bf16 %v6867_v4, %v6865_v63 }
 0x219   :  { %1931 = vmatmul.mubr.f32.gmra.mrb[18].mxu1 %v6022_v51  ;;  %v6870_v51 = vand.u32 4294901760, %v6792_v24  ;;  %v6874_v24 = vld [vmem:[#allocation24_spill] sm:$0xff] }
 0x21a   :  { %4470 = vmatpush1.bf16.msra.mxu1 %v4469_v59  ;;  %1936 = vmatprep.mubr.f32.mxu1 %v6734_v26 }
 0x21b   :  { %4702 = vmatpush3.bf16.msra.mxu0 %v6863_v23  ;;  %4472 = vmatprep.subr.bf16.mxu1 %v4471_v53  ;;  %v4477_v11 = vpack.c.bf16 %v6871_v13, %v6870_v51 }
 0x21d   :  { %1940 = vmatmul.mubr.f32.gmra.mrb[20].mxu1 %v6038_v19  ;;  %v6872_v19 = vld [vmem:[#allocation19_spill] sm:$0xff] }
 0x21e   :  { %4474 = vmatpush1.bf16.msra.mxu1 %v4473_v29  ;;  %4116 = vmatmul.mubr.f32.vlgmr.msra.gmra.mrb[8].mxu0 %v5921_v55 }
 0x21f   :  { %4118 = vmatprep.mubr.f32.mxu0 %v5943_v35  ;;  %1945 = vmatprep.mubr.f32.mxu1 %v6734_v26 }
 0x220   :  { %4476 = vmatprep.subr.bf16.mxu1 %v4475_v28 }
 0x221   :  { %1949 = vmatmul.mubr.f32.gmra.mrb[22].mxu1 %v6051_v61  ;;  %v6873_v61 = vld [vmem:[#allocation23_spill] sm:$0xff] }
 0x222   :  { %4478 = vmatpush1.bf16.msra.mxu1 %v4477_v11  ;;  %4119 = vmatmul.mubr.f32.gmra.mrb[10].mxu0 %v5934_v37 }
 0x223   :  { %4121 = vmatprep.mubr.f32.mxu0 %v5960_v56  ;;  %2115 = vmatprep.mubr.f32.mxu1 %v6734_v26 }
 0x224   :  { %4480 = vmatprep.subr.bf16.mxu1 %v6794_v40 }
 0x225   :  { %2117 = vmatmul.mubr.f32.vlgmr.msra.gmra.mrb[8].mxu1 %v5923_v62 }
 0x226   :  { %4482 = vmatpush1.bf16.msra.mxu1 %v6872_v19  ;;  %4122 = vmatmul.mubr.f32.gmra.mrb[12].mxu0 %v5967_v25 }
 0x227   :  { %4124 = vmatprep.mubr.f32.mxu0 %v5980_v6  ;;  %2122 = vmatprep.mubr.f32.mxu1 %v6734_v26 }
 0x228   :  { %4484 = vmatprep.subr.bf16.mxu1 %v6873_v61 }
 0x229   :  { %2124 = vmatmul.mubr.f32.gmra.mrb[10].mxu1 %v5921_v55 }
 0x22a   :  { %4486 = vmatpush1.bf16.msra.mxu1 %v6874_v24  ;;  %4125 = vmatmul.mubr.f32.gmra.mrb[14].mxu0 %v5988_v46 }
 0x22b   :  { %2129 = vmatprep.mubr.f32.mxu1 %v6734_v26  ;;  %4488 = vmatprep.subr.bf16.mxu1 %v6875_v45 }
 0x22d   :  { %2131 = vmatmul.mubr.f32.gmra.mrb[12].mxu1 %v5943_v35 }
 0x22e   :  { %4490 = vmatpush1.bf16.msra.mxu1 %v6808_v5  ;;  %2136 = vmatprep.mubr.f32.mxu1 %v6734_v26  ;;  %v1112_v5 = vlaneseq }
 0x22f   :  { %4492 = vmatprep.subr.bf16.mxu1 %v6876_v38 }
 0x231   :  { %2138 = vmatmul.mubr.f32.gmra.mrb[14].mxu1 %v5934_v37 }
 0x232   :  { %4494 = vmatpush1.bf16.msra.mxu1 %v6814_v41  ;;  %2143 = vmatprep.mubr.f32.mxu1 %v6734_v26  ;;  %v1113_v41 = vshrl.u32 %v1112_v5, 7 }
 0x233   :  { %4496 = vmatprep.subr.bf16.mxu1 %v6815_v30 }
 0x234   :  { %v1114_v30 = vsub.s32 0, %v1113_v41  ;;  %v1122_v60 = vsub.s32 2, %v1113_v41 }
 0x235   :  { %2145 = vmatmul.mubr.f32.gmra.mrb[16].mxu1 %v5960_v56 }
 0x236   :  { %4498 = vmatpush1.bf16.msra.mxu1 %v6820_v8  ;;  %2150 = vmatprep.mubr.f32.mxu1 %v6734_v26  ;;  %v1110_v8 = vld [vmem:[%s6460_s4] sm:$0x7]  ;;  %s4998_s4 = smov [#allocation8]  }
 0x237   :  { %4500 = vmatprep.subr.bf16.mxu1 %v6821_v17  ;;  %v1118_v17 = vsub.s32 1, %v1113_v41  ;;  %v1123_v28 = vrot.slane %v1110_v8, %v1122_v60  ;;  %s3296_s10 = sshll.u32 %s4998_s4, 4  ;;  %s3297_s10 = int_to_ptr.vmem [resolvable:$true] %s3296_s10 }
 0x238   :  { %s4962_s11 = scalar_lea.vmem %s3297_s10, 3072  ;;  %p4967_p11 = scmp.lt.s32.totalorder %s3297_s10, %s3297_s10 }
 0x239   :  { %2152 = vmatmul.mubr.f32.gmra.mrb[18].mxu1 %v5967_v25  ;;  %p4963_p10 = scmp.ne.s32.totalorder %s3297_s10, %s4962_s11  ;;  %p4968_p12 = scmp.lt.s32.totalorder %s4962_s11, %s4962_s11 }
 0x23a   :  { %4502 = vmatpush1.bf16.msra.mxu1 %v6822_v1  ;;  %2157 = vmatprep.mubr.f32.mxu1 %v6734_v26  ;;  %v1115_v1 = vrot.slane %v1110_v8, %v1114_v30 }
 0x23b   :  { %4504 = vmatprep.subr.bf16.mxu1 %v6823_v22  ;;  %v1119_v22 = vrot.slane %v1110_v8, %v1118_v17  ;;  %p4969_p13 = por %p4968_p12, %p4967_p11 }
 0x23d   :  { %2159 = vmatmul.mubr.f32.gmra.mrb[20].mxu1 %v5980_v6  ;;  %p4970_p0 = pnand %p4969_p13, %p4963_p10 }
 0x23e   :  { %4506 = vmatpush1.bf16.msra.mxu1 %v6824_v57  ;;  %2164 = vmatprep.mubr.f32.mxu1 %v6734_v26 }
 0x23f   :  { %4508 = vmatprep.subr.bf16.mxu1 %v6825_v58 }
 0x241   :  { %2166 = vmatmul.mubr.f32.gmra.mrb[22].mxu1 %v5988_v46 }
 0x242   :  { %4510 = vmatpush1.bf16.msra.mxu1 %v6828_v18  ;;  %2268 = vmatprep.mubr.f32.mxu1 %v6734_v26 }
 0x243   :  { %4512 = vmatprep.subr.bf16.mxu1 %v6742_v20 }
 0x245   :  { %2270 = vmatmul.mubr.f32.vlgmr.msra.gmra.mrb[8].mxu1 %v5923_v62  ;;  %v6877_v62 = vld [vmem:[#allocation46_spill] sm:$0xff] }
 0x246   :  { %4514 = vmatpush3.bf16.msra.mxu1 %v6742_v20  ;;  %2275 = vmatprep.mubr.f32.mxu1 %v6734_v26 }
 0x247   :  { %4516 = vmatprep.subr.bf16.mxu1 %v6744_v54 }
 0x249   :  { %2277 = vmatmul.mubr.f32.gmra.mrb[10].mxu1 %v5921_v55  ;;  %v6878_v55 = vld [vmem:[#allocation21_spill] sm:$0xff] }
 0x24a   :  { %4518 = vmatpush3.bf16.msra.mxu1 %v6744_v54  ;;  %2282 = vmatprep.mubr.f32.mxu1 %v6734_v26 }
 0x24b   :  { %4520 = vmatprep.subr.bf16.mxu1 %v6746_v16 }
 0x24d   :  { %2284 = vmatmul.mubr.f32.gmra.mrb[12].mxu1 %v5943_v35  ;;  %v6880_v35 = vld [vmem:[#allocation31_spill] sm:$0xff] }
 0x24e   :  { %4522 = vmatpush3.bf16.msra.mxu1 %v6746_v16  ;;  %2289 = vmatprep.mubr.f32.mxu1 %v6734_v26 }
 0x24f   :  { %4524 = vmatprep.subr.bf16.mxu1 %v6749_v39 }
 0x251   :  { %2291 = vmatmul.mubr.f32.gmra.mrb[14].mxu1 %v5934_v37  ;;  %v6879_v37 = vld [vmem:[#allocation26_spill] sm:$0xff] }
 0x252   :  { %4526 = vmatpush3.bf16.msra.mxu1 %v6749_v39  ;;  %2296 = vmatprep.mubr.f32.mxu1 %v6734_v26 }
 0x253   :  { %4528 = vmatprep.subr.bf16.mxu1 %v6752_v43 }
 0x255   :  { %2298 = vmatmul.mubr.f32.gmra.mrb[16].mxu1 %v5960_v56  ;;  %v6881_v56 = vld [vmem:[#allocation32_spill] sm:$0xff] }
 0x256   :  { %4530 = vmatpush3.bf16.msra.mxu1 %v6752_v43  ;;  %2303 = vmatprep.mubr.f32.mxu1 %v6734_v26 }
 0x257   :  { %4532 = vmatprep.subr.bf16.mxu1 %v6848_v47 }
 0x259   :  { %2305 = vmatmul.mubr.f32.gmra.mrb[18].mxu1 %v5967_v25  ;;  %v6882_v25 = vld [vmem:[#allocation70_spill] sm:$0xff] }
 0x25a   :  { %4534 = vmatpush3.bf16.msra.mxu1 %v6848_v47  ;;  %2310 = vmatprep.mubr.f32.mxu1 %v6734_v26 }
 0x25b   :  { %4536 = vmatprep.subr.bf16.mxu1 %v6857_v36 }
 0x25d   :  { %2312 = vmatmul.mubr.f32.gmra.mrb[20].mxu1 %v5980_v6  ;;  %v6883_v6 = vld [vmem:[#allocation71_spill] sm:$0xff] }
 0x25e   :  { %4538 = vmatpush3.bf16.msra.mxu1 %v6857_v36  ;;  %2317 = vmatprep.mubr.f32.mxu1 %v6734_v26  ;;  %v6884_v26 = vld [vmem:[#allocation12_spill] sm:$0xff] }
 0x25f   :  { %4540 = vmatprep.subr.bf16.mxu1 %v6863_v23 }
 0x261   :  { %2319 = vmatmul.mubr.f32.gmra.mrb[22].mxu1 %v5988_v46 }
 0x262   :  { %4542 = vmatpush3.bf16.msra.mxu1 %v6863_v23  ;;  %3895 = vmatprep.mubr.f32.mxu1 %v6877_v62 }
 0x265   :  { %3896 = vmatmul.mubr.f32.vlgmr.msra.gmra.mrb[24].mxu1 %v6878_v55 }
 0x266   :  { %3898 = vmatprep.mubr.f32.mxu1 %v6879_v37 }
 0x269   :  { %3899 = vmatmul.mubr.f32.gmra.mrb[26].mxu1 %v6880_v35 }
 0x26a   :  { %3901 = vmatprep.mubr.f32.mxu1 %v6881_v56 }
 0x26d   :  { %3902 = vmatmul.mubr.f32.gmra.mrb[28].mxu1 %v6882_v25 }
 0x26e   :  { %3904 = vmatprep.mubr.f32.mxu1 %v6883_v6 }
 0x271   :  { %3905 = vmatmul.mubr.f32.gmra.mrb[30].mxu1 %v6884_v26 }
 0x2f1   :  { %v6414_v20 = vpop.f32.mrb[8].mxu0 }
 0x2f2   :  { %v6416_v46 = vpop.f32.mrb[9].mxu0 }
 0x2f5   :  { %v6418_v54 = vpop.f32.mrb[10].mxu0 }
 0x2f6   :  { %v6420_v16 = vpop.f32.mrb[11].mxu0 }
 0x2f9   :  { %v6422_v39 = vpop.f32.mrb[12].mxu0 }
 0x2fa   :  { %v6424_v43 = vpop.f32.mrb[13].mxu0 }
 0x2fd   :  { %v6426_v31 = vpop.f32.mrb[14].mxu0 }
 0x2fe   :  { %v6428_v40 = vpop.f32.mrb[15].mxu0 }
 0x318   :  { %v2271_v57 = vpop.f32.mrb[8].mxu1 }
 0x319   :  { %v4711_v58 = vadd.f32 %v2271_v57, %v1115_v1  ;;  %v2273_v18 = vpop.f32.mrb[9].mxu1 }
 0x31a   :  { %v4712_v9 = vadd.f32 %v2273_v18, %v1119_v22 }
 0x31b   :  { %3267 = vst [vmem:[#allocation8] sm:$0xff] %v4711_v58 }
 0x31c   :  { %3268 = vst [vmem:[#allocation8 + $0x8] sm:$0xff] %v4712_v9  ;;  %v2278_v15 = vpop.f32.mrb[10].mxu1 }
 0x31d   :  { %v4713_v47 = vadd.f32 %v2278_v15, %v1115_v1  ;;  %v2280_v0 = vpop.f32.mrb[11].mxu1 }
 0x31e   :  { %v4714_v21 = vadd.f32 %v2280_v0, %v1119_v22 }
 0x31f   :  { %3270 = vst [vmem:[#allocation8 + $0x18] sm:$0xff] %v4713_v47 }
 0x320   :  { %3271 = vst [vmem:[#allocation8 + $0x20] sm:$0xff] %v4714_v21  ;;  %v2285_v3 = vpop.f32.mrb[12].mxu1 }
 0x321   :  { %v4715_v12 = vadd.f32 %v2285_v3, %v1115_v1  ;;  %v2287_v32 = vpop.f32.mrb[13].mxu1 }
 0x322   :  { %v4716_v34 = vadd.f32 %v2287_v32, %v1119_v22 }
 0x323   :  { %3273 = vst [vmem:[#allocation8 + $0x30] sm:$0xff] %v4715_v12 }
 0x324   :  { %3274 = vst [vmem:[#allocation8 + $0x38] sm:$0xff] %v4716_v34  ;;  %v2292_v27 = vpop.f32.mrb[14].mxu1 }
 0x325   :  { %v4717_v10 = vadd.f32 %v2292_v27, %v1115_v1  ;;  %v2294_v42 = vpop.f32.mrb[15].mxu1 }
 0x326   :  { %v4718_v14 = vadd.f32 %v2294_v42, %v1119_v22 }
 0x327   :  { %3276 = vst [vmem:[#allocation8 + $0x48] sm:$0xff] %v4717_v10 }
 0x328   :  { %3277 = vst [vmem:[#allocation8 + $0x50] sm:$0xff] %v4718_v14  ;;  %v2299_v36 = vpop.f32.mrb[16].mxu1 }
 0x329   :  { %v4719_v48 = vadd.f32 %v2299_v36, %v1115_v1  ;;  %v2301_v49 = vpop.f32.mrb[17].mxu1 }
 0x32a   :  { %v4720_v52 = vadd.f32 %v2301_v49, %v1119_v22 }
 0x32b   :  { %3279 = vst [vmem:[#allocation8 + $0x60] sm:$0xff] %v4719_v48 }
 0x32c   :  { %3280 = vst [vmem:[#allocation8 + $0x68] sm:$0xff] %v4720_v52  ;;  %v2306_v59 = vpop.f32.mrb[18].mxu1 }
 0x32d   :  { %v4721_v44 = vadd.f32 %v2306_v59, %v1115_v1  ;;  %v2308_v2 = vpop.f32.mrb[19].mxu1 }
 0x32e   :  { %v4722_v53 = vadd.f32 %v2308_v2, %v1119_v22 }
 0x32f   :  { %3282 = vst [vmem:[#allocation8 + $0x78] sm:$0xff] %v4721_v44 }
 0x330   :  { %3283 = vst [vmem:[#allocation8 + $0x80] sm:$0xff] %v4722_v53  ;;  %v2313_v23 = vpop.f32.mrb[20].mxu1 }
 0x331   :  { %v4723_v33 = vadd.f32 %v2313_v23, %v1115_v1  ;;  %v2315_v63 = vpop.f32.mrb[21].mxu1 }
 0x332   :  { %v4724_v4 = vadd.f32 %v2315_v63, %v1119_v22 }
 0x333   :  { %3285 = vst [vmem:[#allocation8 + $0x90] sm:$0xff] %v4723_v33 }
 0x334   :  { %3286 = vst [vmem:[#allocation8 + $0x98] sm:$0xff] %v4724_v4  ;;  %v2320_v29 = vpop.f32.mrb[22].mxu1 }
 0x335   :  { %v4725_v7 = vadd.f32 %v2320_v29, %v1115_v1  ;;  %v2322_v50 = vpop.f32.mrb[23].mxu1 }
 0x336   :  { %v4726_v51 = vadd.f32 %v2322_v50, %v1119_v22 }
 0x337   :  { %3288 = vst [vmem:[#allocation8 + $0xa8] sm:$0xff] %v4725_v7 }
 0x338   :  { %3289 = vst [vmem:[#allocation8 + $0xb0] sm:$0xff] %v4726_v51  ;;  %v3897_v13 = vpop.f32.mrb[24].mxu1 }
 0x339   :  { %v2423_v11 = vadd.f32 %v3897_v13, %v1123_v28  ;;  %v2412_v19 = vpop.f32.mrb[25].mxu1 }
 0x33a   :  { %v2413_v61 = vadd.f32 %v2412_v19, %v1123_v28 }
 0x33b   :  { %v4728_v24 = vadd.f32 %v6414_v20, %v2423_v11 }
 0x33c   :  { %v4730_v45 = vadd.f32 %v6416_v46, %v2413_v61  ;;  %v3900_v38 = vpop.f32.mrb[26].mxu1 }
 0x33d   :  { %3272 = vst [vmem:[#allocation8 + $0x28] sm:$0xff] %v4728_v24  ;;  %v2443_v62 = vadd.f32 %v3900_v38, %v1123_v28  ;;  %v2432_v55 = vpop.f32.mrb[27].mxu1 }
 0x33e   :  { %3269 = vst [vmem:[#allocation8 + $0x10] sm:$0xff] %v4730_v45  ;;  %v2433_v37 = vadd.f32 %v2432_v55, %v1123_v28 }
 0x33f   :  { %v4732_v35 = vadd.f32 %v6418_v54, %v2443_v62 }
 0x340   :  { %v4734_v56 = vadd.f32 %v6420_v16, %v2433_v37  ;;  %v3903_v25 = vpop.f32.mrb[28].mxu1 }
 0x341   :  { %3278 = vst [vmem:[#allocation8 + $0x58] sm:$0xff] %v4732_v35  ;;  %v2463_v6 = vadd.f32 %v3903_v25, %v1123_v28  ;;  %v2452_v26 = vpop.f32.mrb[29].mxu1 }
 0x342   :  { %3275 = vst [vmem:[#allocation8 + $0x40] sm:$0xff] %v4734_v56  ;;  %v2453_v5 = vadd.f32 %v2452_v26, %v1123_v28 }
 0x343   :  { %v4736_v20 = vadd.f32 %v6422_v39, %v2463_v6 }
 0x344   :  { %v4738_v46 = vadd.f32 %v6424_v43, %v2453_v5  ;;  %v3906_v41 = vpop.f32.mrb[30].mxu1 }
 0x345   :  { %3284 = vst [vmem:[#allocation8 + $0x88] sm:$0xff] %v4736_v20  ;;  %v2483_v30 = vadd.f32 %v3906_v41, %v1123_v28  ;;  %v2472_v8 = vpop.f32.mrb[31].mxu1 }
 0x346   :  { %3281 = vst [vmem:[#allocation8 + $0x70] sm:$0xff] %v4738_v46  ;;  %v2473_v54 = vadd.f32 %v2472_v8, %v1123_v28 }
 0x347   :  { %v4740_v16 = vadd.f32 %v6426_v31, %v2483_v30 }
 0x348   :  { %v4742_v17 = vadd.f32 %v6428_v40, %v2473_v54 }
 0x349   :  { %3290 = vst [vmem:[#allocation8 + $0xb8] sm:$0xff] %v4740_v16 }
 0x34a   :  { %3287 = vst [vmem:[#allocation8 + $0xa0] sm:$0xff] %v4742_v17 }
 0x34b   :  { %4973 = shalt.err (!%p4970_p0)
}
 0x34c   :  { %s4974_s14 = scalar_lea.hbm %s6461_s5, 3072 }
 0x34d   :  { %p4975_p1 = scmp.ne.s32.totalorder %s6461_s5, %s4974_s14  ;;  %p4978_p2 = scmp.lt.u32.totalorder %s4974_s14, %s6461_s5 }
 0x34f   :  { %p4980_p3 = pnand %p4978_p2, %p4975_p1 }
 0x351   :  { %4983 = shalt.err (!%p4980_p3)
}
 0x352   :  { %3302 = dma.vmem_to_hbm [thread:$0]  %s3297_s10, 3072, %s6461_s5, [#allocation4], %s4995_s0, %s4995_s0, %s4996_s21  }
 0x353   :  { %4988 = dma.done.wait [#allocation4], 3072  }
 0x354   :  { %4989 = vsyncadd [#allocation4], 4294964224 }
 0x355   :  { %3306 = vsyncpa [#allocation3], 1 }
 0x356   :  { %3307 = vsyncpa [#allocation6], 1 }
 0x357   :  { %3308 = vsyncpa [#allocation4], 1 }

</bundles_post_ra>
